<compile_context>
chip_gen: v5e
topology: v5e:2x2
jax: 0.10.0
libtpu: 0.0.40
codegen_flags: <defaults>
</compile_context>

<pallas_src>
import functools

import jax
import jax.numpy as jnp
from jax import lax
from jax.experimental import pallas as pl
from jax.experimental.pallas import tpu as pltpu

EPS = 1e-5  # nn.LayerNorm default eps


def mamba_block_kernel(
    xt_ref,     # (Lc, Bblk, D)  input block, time-major within chunk
    vecd_ref,   # (8, D)         rows: [g1, b1, g2, b2, Dskip, bc, bo, bmo]
    a_ref,      # (1, S)         SSM A
    wbt_ref,    # (D, S+1)       fused [B_proj | time_proj] weight
    bbt_ref,    # (1, S+1)       fused [B_proj | time_proj] bias
    wc_ref,     # (S, D)         C_proj
    wo_ref,     # (D, D)         out_proj
    wh_ref,     # (D, H)         mlp_in, hidden half
    wg_ref,     # (D, H)         mlp_in, gate half
    bhg_ref,    # (2, H)         rows: [b_hidden, b_gate]
    wmo_ref,    # (H, D)         mlp_out
    out_ref,    # (Lc, Bblk, D)
    h_ref,      # VMEM (Bblk, S)      carried scan state across seq chunks
    aexp_ref,   # VMEM (Lc*Bblk, S)   exp(A*delta) staging
    hall_ref,   # VMEM (Lc*Bblk, S)   B matrix, overwritten in place with hidden states
    *, bblk, lchunk, d_state,
):
    j = pl.program_id(1)                                 # sequence-chunk index

    lc, bb, d = xt_ref.shape
    n = lc * bb
    x = xt_ref[...].reshape(n, d)                        # row r = t*Bblk + b (time-major)

    g1 = vecd_ref[0:1, :]
    b1 = vecd_ref[1:2, :]
    g2 = vecd_ref[2:3, :]
    b2 = vecd_ref[3:4, :]
    dskip = vecd_ref[4:5, :]
    bc = vecd_ref[5:6, :]
    bo = vecd_ref[6:7, :]
    bmo = vecd_ref[7:8, :]

    # ---------------- LayerNorm 1 ----------------
    mu = jnp.mean(x, axis=-1, keepdims=True)
    var = jnp.mean((x - mu) ** 2, axis=-1, keepdims=True)
    xn1 = (x - mu) * lax.rsqrt(var + EPS) * g1 + b1

    # ------- fused [B_proj | time_proj] : one MXU pass, B lane-aligned at 0 -------
    fused = jnp.dot(xn1, wbt_ref[...], preferred_element_type=jnp.float32) + bbt_ref[...]
    bmat = fused[:, :d_state]                            # (N, S) starts at lane 0
    delta = jax.nn.sigmoid(fused[:, d_state:d_state + 1]) * 0.99 + 0.01
    aexp = jnp.exp(a_ref[...] * delta)                   # (N, S)

    # Stage into VMEM scratch; hall is pre-filled with B so the scan reads/writes in place.
    aexp_ref[...] = aexp
    hall_ref[...] = bmat

    # ---------------- sequential scan over this chunk ----------------
    @pl.when(j == 0)
    def _():
        h_ref[...] = jnp.zeros_like(h_ref)

    def scan_body(t, h):
        r = pl.multiple_of(t * bblk, 8)                  # 8-sublane aligned slab
        sl = pl.ds(r, bblk)
        h = aexp_ref[sl, :] * h + hall_ref[sl, :]
        hall_ref[sl, :] = h
        return h

    h_ref[...] = lax.fori_loop(0, lchunk, scan_body, h_ref[...], unroll=8)

    # ---------------- C_proj, skip, out_proj, residual ----------------
    outputs = jnp.dot(hall_ref[...], wc_ref[...], preferred_element_type=jnp.float32) + bc
    y = outputs + xn1 * dskip
    ssm_out = jnp.dot(y, wo_ref[...], preferred_element_type=jnp.float32) + bo
    x1 = x + ssm_out                                     # dropout = identity (eval)

    # ---------------- LayerNorm 2 + gated MLP ----------------
    mu2 = jnp.mean(x1, axis=-1, keepdims=True)
    var2 = jnp.mean((x1 - mu2) ** 2, axis=-1, keepdims=True)
    xn2 = (x1 - mu2) * lax.rsqrt(var2 + EPS) * g2 + b2

    hid = jnp.dot(xn2, wh_ref[...], preferred_element_type=jnp.float32) + bhg_ref[0:1, :]
    gate = jnp.dot(xn2, wg_ref[...], preferred_element_type=jnp.float32) + bhg_ref[1:2, :]
    act = hid * (gate * jax.nn.sigmoid(gate))            # mlp_hidden * silu(gate)

    out = x1 + (jnp.dot(act, wmo_ref[...], preferred_element_type=jnp.float32) + bmo)
    out_ref[...] = out.reshape(lc, bb, d)


def mamba_block(x, p, *, batch_block=8, max_chunk=128):
    B, L, D = x.shape
    S = p["A"].shape[-1]
    H = p["Wmo"].shape[0]

    # Pad batch to a full sublane group so all scan slabs are (8, S) aligned.
    Bp = ((B + batch_block - 1) // batch_block) * batch_block
    if Bp != B:
        x = jnp.concatenate([x, jnp.zeros((Bp - B, L, D), x.dtype)], axis=0)

    # Time-major layout: (L, Bp, D).  Stays in XLA (fuses under jit).
    xt = jnp.transpose(x, (1, 0, 2))

    # Largest chunk length <= max_chunk that divides L.
    lc = L
    for cand in range(min(L, max_chunk), 0, -1):
        if L % cand == 0:
            lc = cand
            break

    # Wrapper-side layout plumbing: packed small vectors, fused/reordered projection
    # weights ([Wb | Wt] so the S-wide slice is lane-aligned), split MLP weights.
    vecd = jnp.concatenate(
        [p["g1"], p["b1"], p["g2"], p["b2"], p["D"], p["bc"], p["bo"], p["bmo"]],
        axis=0,
    )                                                    # (8, D)
    wbt = jnp.concatenate([p["Wb"], p["Wt"]], axis=1)    # (D, S+1)
    bbt = jnp.concatenate([p["bb"], p["bt"]], axis=1)    # (1, S+1)
    wh = p["Wmi"][:, :H]
    wg = p["Wmi"][:, H:]
    bhg = jnp.concatenate([p["bmi"][:, :H], p["bmi"][:, H:]], axis=0)   # (2, H)

    grid = (Bp // batch_block, L // lc)

    def xmap(i, j):
        return (j, i, 0)

    def const2(i, j):
        return (0, 0)

    kernel = functools.partial(
        mamba_block_kernel, bblk=batch_block, lchunk=lc, d_state=S
    )

    out_t = pl.pallas_call(
        kernel,
        out_shape=jax.ShapeDtypeStruct((L, Bp, D), jnp.float32),
        grid=grid,
        in_specs=[
            pl.BlockSpec((lc, batch_block, D), xmap),    # activations: tiled, pipelined
            pl.BlockSpec((8, D), const2),                # weights: resident in VMEM
            pl.BlockSpec((1, S), const2),
            pl.BlockSpec((D, S + 1), const2),
            pl.BlockSpec((1, S + 1), const2),
            pl.BlockSpec((S, D), const2),
            pl.BlockSpec((D, D), const2),
            pl.BlockSpec((D, H), const2),
            pl.BlockSpec((D, H), const2),
            pl.BlockSpec((2, H), const2),
            pl.BlockSpec((H, D), const2),
        ],
        out_specs=pl.BlockSpec((lc, batch_block, D), xmap),
        scratch_shapes=[
            pltpu.VMEM((batch_block, S), jnp.float32),         # carried scan state
            pltpu.VMEM((lc * batch_block, S), jnp.float32),    # exp(A*delta)
            pltpu.VMEM((lc * batch_block, S), jnp.float32),    # B -> hidden states
        ],
        compiler_params=pltpu.CompilerParams(
            dimension_semantics=("parallel", "arbitrary"),
            vmem_limit_bytes=64 * 1024 * 1024,
        ),
    )(xt, vecd, p["A"], wbt, bbt, p["Wc"], p["Wo"], wh, wg, bhg, p["Wmo"])

    return jnp.transpose(out_t, (1, 0, 2))[:B]


def init_params(key, d_model=32, d_state=16, expansion=2):
    H = d_model * expansion
    keys = jax.random.split(key, 8)

    def lin(k, fan_in, fan_out):
        kw, kb = jax.random.split(k)
        w = jax.random.normal(kw, (fan_in, fan_out), jnp.float32) / jnp.sqrt(
            jnp.float32(fan_in)
        )
        b = jax.random.normal(kb, (1, fan_out), jnp.float32) * 0.01
        return w, b

    Wt, bt = lin(keys[0], d_model, 1)
    Wb, bb = lin(keys[1], d_model, d_state)
    Wc, bc = lin(keys[2], d_state, d_model)
    Wo, bo = lin(keys[3], d_model, d_model)
    Wmi, bmi = lin(keys[4], d_model, 2 * H)
    Wmo, bmo = lin(keys[5], H, d_model)
    A = jax.random.normal(keys[6], (1, d_state), jnp.float32) * 0.1 - 1.0

    return dict(
        g1=jnp.ones((1, d_model), jnp.float32),
        b1=jnp.zeros((1, d_model), jnp.float32),
        g2=jnp.ones((1, d_model), jnp.float32),
        b2=jnp.zeros((1, d_model), jnp.float32),
        A=A,
        D=jnp.ones((1, d_model), jnp.float32),
        Wt=Wt, bt=bt, Wb=Wb, bb=bb, Wc=Wc, bc=bc, Wo=Wo, bo=bo,
        Wmi=Wmi, bmi=bmi, Wmo=Wmo, bmo=bmo,
    )


def ref_forward(x, p):
    """Pure-JAX reference matching the PyTorch forward (eval mode)."""
    def layernorm(v, g, b):
        mu = jnp.mean(v, axis=-1, keepdims=True)
        var = jnp.mean((v - mu) ** 2, axis=-1, keepdims=True)
        return (v - mu) / jnp.sqrt(var + EPS) * g + b

    Bsz, L, D = x.shape
    S = p["A"].shape[-1]
    xn1 = layernorm(x, p["g1"], p["b1"])
    delta = jax.nn.sigmoid(xn1 @ p["Wt"] + p["bt"]) * 0.99 + 0.01      # (B, L, 1)
    Bm = xn1 @ p["Wb"] + p["bb"]                                       # (B, L, S)
    A_exp = jnp.exp(p["A"] * delta)                                    # (B, L, S)
    h = jnp.zeros((Bsz, S), jnp.float32)
    outs = []
    for t in range(L):
        h = A_exp[:, t] * h + Bm[:, t]
        outs.append(h @ p["Wc"] + p["bc"])
    outputs = jnp.stack(outs, axis=1)
    y = outputs + xn1 * p["D"]
    x1 = x + (y @ p["Wo"] + p["bo"])
    xn2 = layernorm(x1, p["g2"], p["b2"])
    mlp = xn2 @ p["Wmi"] + p["bmi"]
    H = p["Wmo"].shape[0]
    hid, gate = mlp[..., :H], mlp[..., H:]
    act = hid * (gate * jax.nn.sigmoid(gate))
    return x1 + (act @ p["Wmo"] + p["bmo"])


if __name__ == "__main__":
    key = jax.random.PRNGKey(0)
    kx, kp = jax.random.split(key)

    B, L, D = 2, 8, 32          # batch, seq_len, d_model
    params = init_params(kp, d_model=D, d_state=16, expansion=2)
    x = jax.random.normal(kx, (B, L, D), jnp.float32)

    fwd = jax.jit(mamba_block)
    out = jax.block_until_ready(fwd(x, params))
    assert out.shape == (B, L, D) and out.dtype == jnp.float32

    ref = ref_forward(x, params)
    max_err = float(jnp.max(jnp.abs(out - ref)))
    if not bool(jnp.allclose(out, ref, atol=2e-3, rtol=2e-3)):
        raise AssertionError(f"Pallas output mismatch vs reference: max abs err {max_err}")

    print("KERNEL_OK")
</pallas_src>

<mosaic_0001>
module attributes {stable_mosaic.version = 11 : i64} {
  func.func @mamba_block_kernel(%arg0: i32, %arg1: i32, %arg2: memref<8x8x32xf32, #tpu.memory_space<vmem>>, %arg3: memref<8x32xf32, #tpu.memory_space<vmem>>, %arg4: memref<1x16xf32, #tpu.memory_space<vmem>>, %arg5: memref<32x17xf32, #tpu.memory_space<vmem>>, %arg6: memref<1x17xf32, #tpu.memory_space<vmem>>, %arg7: memref<16x32xf32, #tpu.memory_space<vmem>>, %arg8: memref<32x32xf32, #tpu.memory_space<vmem>>, %arg9: memref<32x64xf32, #tpu.memory_space<vmem>>, %arg10: memref<32x64xf32, #tpu.memory_space<vmem>>, %arg11: memref<2x64xf32, #tpu.memory_space<vmem>>, %arg12: memref<64x32xf32, #tpu.memory_space<vmem>>, %arg13: memref<8x8x32xf32, #tpu.memory_space<vmem>>, %arg14: memref<8x16xf32, #tpu.memory_space<vmem>>, %arg15: memref<64x16xf32, #tpu.memory_space<vmem>>, %arg16: memref<64x16xf32, #tpu.memory_space<vmem>>) attributes {dimension_semantics = [#tpu.dimension_semantics<parallel>, #tpu.dimension_semantics<arbitrary>], iteration_bounds = array<i64: 1, 1>, scalar_prefetch = 0 : i64, scratch_operands = 3 : i64, tpu.core_type = #tpu.core_type<tc>, window_params = [{transform_indices = @transform_0, window_bounds = array<i64: 8, 8, 32>}, {pipeline_mode = #tpu.pipeline_mode<synchronous>, transform_indices = @transform_1, window_bounds = array<i64: 8, 32>}, {pipeline_mode = #tpu.pipeline_mode<synchronous>, transform_indices = @transform_2, window_bounds = array<i64: 1, 16>}, {pipeline_mode = #tpu.pipeline_mode<synchronous>, transform_indices = @transform_3, window_bounds = array<i64: 32, 17>}, {pipeline_mode = #tpu.pipeline_mode<synchronous>, transform_indices = @transform_4, window_bounds = array<i64: 1, 17>}, {pipeline_mode = #tpu.pipeline_mode<synchronous>, transform_indices = @transform_5, window_bounds = array<i64: 16, 32>}, {pipeline_mode = #tpu.pipeline_mode<synchronous>, transform_indices = @transform_6, window_bounds = array<i64: 32, 32>}, {pipeline_mode = #tpu.pipeline_mode<synchronous>, transform_indices = @transform_7, window_bounds = array<i64: 32, 64>}, {pipeline_mode = #tpu.pipeline_mode<synchronous>, transform_indices = @transform_8, window_bounds = array<i64: 32, 64>}, {pipeline_mode = #tpu.pipeline_mode<synchronous>, transform_indices = @transform_9, window_bounds = array<i64: 2, 64>}, {pipeline_mode = #tpu.pipeline_mode<synchronous>, transform_indices = @transform_10, window_bounds = array<i64: 64, 32>}, {transform_indices = @transform_11, window_bounds = array<i64: 8, 8, 32>}]} {
    %c0 = arith.constant 0 : index
    %c0_0 = arith.constant 0 : index
    %c0_1 = arith.constant 0 : index
    %0 = vector.load %arg2[%c0, %c0_0, %c0_1] : memref<8x8x32xf32, #tpu.memory_space<vmem>>, vector<8x8x32xf32>
    %1 = vector.shape_cast %0 : vector<8x8x32xf32> to vector<64x32xf32>
    %c0_2 = arith.constant 0 : index
    %c0_3 = arith.constant 0 : index
    %2 = vector.load %arg3[%c0_2, %c0_3] : memref<8x32xf32, #tpu.memory_space<vmem>>, vector<1x32xf32>
    %c1 = arith.constant 1 : index
    %c0_4 = arith.constant 0 : index
    %3 = vector.load %arg3[%c1, %c0_4] : memref<8x32xf32, #tpu.memory_space<vmem>>, vector<1x32xf32>
    %c2 = arith.constant 2 : index
    %c0_5 = arith.constant 0 : index
    %4 = vector.load %arg3[%c2, %c0_5] : memref<8x32xf32, #tpu.memory_space<vmem>>, vector<1x32xf32>
    %c3 = arith.constant 3 : index
    %c0_6 = arith.constant 0 : index
    %5 = vector.load %arg3[%c3, %c0_6] : memref<8x32xf32, #tpu.memory_space<vmem>>, vector<1x32xf32>
    %c4 = arith.constant 4 : index
    %c0_7 = arith.constant 0 : index
    %6 = vector.load %arg3[%c4, %c0_7] : memref<8x32xf32, #tpu.memory_space<vmem>>, vector<1x32xf32>
    %c5 = arith.constant 5 : index
    %c0_8 = arith.constant 0 : index
    %7 = vector.load %arg3[%c5, %c0_8] : memref<8x32xf32, #tpu.memory_space<vmem>>, vector<1x32xf32>
    %c6 = arith.constant 6 : index
    %c0_9 = arith.constant 0 : index
    %8 = vector.load %arg3[%c6, %c0_9] : memref<8x32xf32, #tpu.memory_space<vmem>>, vector<1x32xf32>
    %c7 = arith.constant 7 : index
    %c0_10 = arith.constant 0 : index
    %9 = vector.load %arg3[%c7, %c0_10] : memref<8x32xf32, #tpu.memory_space<vmem>>, vector<1x32xf32>
    %cst = arith.constant dense<0.000000e+00> : vector<64xf32>
    %10 = vector.multi_reduction <add>, %1, %cst [1] : vector<64x32xf32> to vector<64xf32>
    %11 = vector.shape_cast %10 : vector<64xf32> to vector<64x1xf32>
    %cst_11 = arith.constant 3.200000e+01 : f32
    %12 = vector.broadcast %cst_11 : f32 to vector<64x1xf32>
    %13 = arith.divf %11, %12 : vector<64x1xf32>
    %14 = vector.broadcast %13 : vector<64x1xf32> to vector<64x32xf32>
    %15 = arith.subf %1, %14 : vector<64x32xf32>
    %16 = arith.mulf %15, %15 : vector<64x32xf32>
    %cst_12 = arith.constant dense<0.000000e+00> : vector<64xf32>
    %17 = vector.multi_reduction <add>, %16, %cst_12 [1] : vector<64x32xf32> to vector<64xf32>
    %18 = vector.shape_cast %17 : vector<64xf32> to vector<64x1xf32>
    %cst_13 = arith.constant 3.200000e+01 : f32
    %19 = vector.broadcast %cst_13 : f32 to vector<64x1xf32>
    %20 = arith.divf %18, %19 : vector<64x1xf32>
    %21 = vector.broadcast %13 : vector<64x1xf32> to vector<64x32xf32>
    %22 = arith.subf %1, %21 : vector<64x32xf32>
    %cst_14 = arith.constant 9.99999974E-6 : f32
    %23 = vector.broadcast %cst_14 : f32 to vector<64x1xf32>
    %24 = arith.addf %20, %23 : vector<64x1xf32>
    %25 = math.rsqrt %24 : vector<64x1xf32>
    %26 = vector.broadcast %25 : vector<64x1xf32> to vector<64x32xf32>
    %27 = arith.mulf %22, %26 : vector<64x32xf32>
    %28 = vector.broadcast %2 : vector<1x32xf32> to vector<64x32xf32>
    %29 = arith.mulf %27, %28 : vector<64x32xf32>
    %30 = vector.broadcast %3 : vector<1x32xf32> to vector<64x32xf32>
    %31 = arith.addf %29, %30 : vector<64x32xf32>
    %c0_15 = arith.constant 0 : index
    %c0_16 = arith.constant 0 : index
    %32 = vector.load %arg5[%c0_15, %c0_16] : memref<32x17xf32, #tpu.memory_space<vmem>>, vector<32x17xf32>
    %cst_17 = arith.constant dense<0.000000e+00> : vector<64x17xf32>
    %33 = tpu.matmul %31, %32, %cst_17 {dimension_numbers = #tpu.dot_dimension_numbers<[1], [0], [0], [1], [0, 0, 1, 1], [], []>} : vector<64x32xf32>, vector<32x17xf32>, vector<64x17xf32> -> vector<64x17xf32>
    %c0_18 = arith.constant 0 : index
    %c0_19 = arith.constant 0 : index
    %34 = vector.load %arg6[%c0_18, %c0_19] : memref<1x17xf32, #tpu.memory_space<vmem>>, vector<1x17xf32>
    %35 = vector.broadcast %34 : vector<1x17xf32> to vector<64x17xf32>
    %36 = arith.addf %33, %35 : vector<64x17xf32>
    %37 = vector.extract_strided_slice %36 {offsets = [0, 0], sizes = [64, 16], strides = [1, 1]} : vector<64x17xf32> to vector<64x16xf32>
    %38 = vector.extract_strided_slice %36 {offsets = [0, 16], sizes = [64, 1], strides = [1, 1]} : vector<64x17xf32> to vector<64x1xf32>
    %39 = arith.negf %38 : vector<64x1xf32>
    %40 = math.exp %39 : vector<64x1xf32>
    %cst_20 = arith.constant 1.000000e+00 : f32
    %41 = vector.broadcast %cst_20 : f32 to vector<64x1xf32>
    %42 = arith.addf %41, %40 : vector<64x1xf32>
    %43 = arith.divf %41, %42 : vector<64x1xf32>
    %cst_21 = arith.constant 9.900000e-01 : f32
    %44 = vector.broadcast %cst_21 : f32 to vector<64x1xf32>
    %45 = arith.mulf %43, %44 : vector<64x1xf32>
    %cst_22 = arith.constant 0.00999999977 : f32
    %46 = vector.broadcast %cst_22 : f32 to vector<64x1xf32>
    %47 = arith.addf %45, %46 : vector<64x1xf32>
    %c0_23 = arith.constant 0 : index
    %c0_24 = arith.constant 0 : index
    %48 = vector.load %arg4[%c0_23, %c0_24] : memref<1x16xf32, #tpu.memory_space<vmem>>, vector<1x16xf32>
    %49 = vector.broadcast %48 : vector<1x16xf32> to vector<64x16xf32>
    %50 = vector.broadcast %47 : vector<64x1xf32> to vector<64x16xf32>
    %51 = arith.mulf %49, %50 : vector<64x16xf32>
    %52 = math.exp %51 : vector<64x16xf32>
    %c0_25 = arith.constant 0 : index
    %c0_26 = arith.constant 0 : index
    %53 = vector.load %arg15[%c0_25, %c0_26] : memref<64x16xf32, #tpu.memory_space<vmem>>, vector<64x16xf32>
    tpu.vector_store %arg15[%c0_25, %c0_26], %52 {strides = array<i32>} : memref<64x16xf32, #tpu.memory_space<vmem>>, vector<64x16xf32>,
    %c0_27 = arith.constant 0 : index
    %c0_28 = arith.constant 0 : index
    %54 = vector.load %arg16[%c0_27, %c0_28] : memref<64x16xf32, #tpu.memory_space<vmem>>, vector<64x16xf32>
    tpu.vector_store %arg16[%c0_27, %c0_28], %37 {strides = array<i32>} : memref<64x16xf32, #tpu.memory_space<vmem>>, vector<64x16xf32>,
    %c0_i32 = arith.constant 0 : i32
    %55 = arith.cmpi eq, %arg1, %c0_i32 : i32
    %56 = arith.extui %55 : i1 to i32
    %c0_i32_29 = arith.constant 0 : i32
    %57 = arith.cmpi ne, %56, %c0_i32_29 : i32
    scf.if %57 {
      %cst_97 = arith.constant 0.000000e+00 : f32
      %199 = vector.broadcast %cst_97 : f32 to vector<8x16xf32>
      %c0_98 = arith.constant 0 : index
      %c0_99 = arith.constant 0 : index
      %200 = vector.load %arg14[%c0_98, %c0_99] : memref<8x16xf32, #tpu.memory_space<vmem>>, vector<8x16xf32>
      tpu.vector_store %arg14[%c0_98, %c0_99], %199 {strides = array<i32>} : memref<8x16xf32, #tpu.memory_space<vmem>>, vector<8x16xf32>,
    } else {
    }
    %c0_30 = arith.constant 0 : index
    %c0_31 = arith.constant 0 : index
    %58 = vector.load %arg14[%c0_30, %c0_31] : memref<8x16xf32, #tpu.memory_space<vmem>>, vector<8x16xf32>
    %c0_i32_32 = arith.constant 0 : i32
    %c8_i32 = arith.constant 8 : i32
    %59 = arith.muli %c0_i32_32, %c8_i32 : i32
    %60 = tpu.assume_multiple %59, 8 : i32
    %61 = arith.index_cast %60 : i32 to index
    %c0_33 = arith.constant 0 : index
    %62 = vector.load %arg15[%61, %c0_33] : memref<64x16xf32, #tpu.memory_space<vmem>>, vector<8x16xf32>
    %63 = arith.mulf %62, %58 : vector<8x16xf32>
    %64 = arith.index_cast %60 : i32 to index
    %c0_34 = arith.constant 0 : index
    %65 = vector.load %arg16[%64, %c0_34] : memref<64x16xf32, #tpu.memory_space<vmem>>, vector<8x16xf32>
    %66 = arith.addf %63, %65 : vector<8x16xf32>
    %67 = arith.index_cast %60 : i32 to index
    %c0_35 = arith.constant 0 : index
    %68 = vector.load %arg16[%67, %c0_35] : memref<64x16xf32, #tpu.memory_space<vmem>>, vector<8x16xf32>
    tpu.vector_store %arg16[%67, %c0_35], %66 {strides = array<i32>} : memref<64x16xf32, #tpu.memory_space<vmem>>, vector<8x16xf32>,
    %c1_i32 = arith.constant 1 : i32
    %c8_i32_36 = arith.constant 8 : i32
    %69 = arith.muli %c1_i32, %c8_i32_36 : i32
    %70 = tpu.assume_multiple %69, 8 : i32
    %71 = arith.index_cast %70 : i32 to index
    %c0_37 = arith.constant 0 : index
    %72 = vector.load %arg15[%71, %c0_37] : memref<64x16xf32, #tpu.memory_space<vmem>>, vector<8x16xf32>
    %73 = arith.mulf %72, %66 : vector<8x16xf32>
    %74 = arith.index_cast %70 : i32 to index
    %c0_38 = arith.constant 0 : index
    %75 = vector.load %arg16[%74, %c0_38] : memref<64x16xf32, #tpu.memory_space<vmem>>, vector<8x16xf32>
    %76 = arith.addf %73, %75 : vector<8x16xf32>
    %77 = arith.index_cast %70 : i32 to index
    %c0_39 = arith.constant 0 : index
    %78 = vector.load %arg16[%77, %c0_39] : memref<64x16xf32, #tpu.memory_space<vmem>>, vector<8x16xf32>
    tpu.vector_store %arg16[%77, %c0_39], %76 {strides = array<i32>} : memref<64x16xf32, #tpu.memory_space<vmem>>, vector<8x16xf32>,
    %c2_i32 = arith.constant 2 : i32
    %c8_i32_40 = arith.constant 8 : i32
    %79 = arith.muli %c2_i32, %c8_i32_40 : i32
    %80 = tpu.assume_multiple %79, 8 : i32
    %81 = arith.index_cast %80 : i32 to index
    %c0_41 = arith.constant 0 : index
    %82 = vector.load %arg15[%81, %c0_41] : memref<64x16xf32, #tpu.memory_space<vmem>>, vector<8x16xf32>
    %83 = arith.mulf %82, %76 : vector<8x16xf32>
    %84 = arith.index_cast %80 : i32 to index
    %c0_42 = arith.constant 0 : index
    %85 = vector.load %arg16[%84, %c0_42] : memref<64x16xf32, #tpu.memory_space<vmem>>, vector<8x16xf32>
    %86 = arith.addf %83, %85 : vector<8x16xf32>
    %87 = arith.index_cast %80 : i32 to index
    %c0_43 = arith.constant 0 : index
    %88 = vector.load %arg16[%87, %c0_43] : memref<64x16xf32, #tpu.memory_space<vmem>>, vector<8x16xf32>
    tpu.vector_store %arg16[%87, %c0_43], %86 {strides = array<i32>} : memref<64x16xf32, #tpu.memory_space<vmem>>, vector<8x16xf32>,
    %c3_i32 = arith.constant 3 : i32
    %c8_i32_44 = arith.constant 8 : i32
    %89 = arith.muli %c3_i32, %c8_i32_44 : i32
    %90 = tpu.assume_multiple %89, 8 : i32
    %91 = arith.index_cast %90 : i32 to index
    %c0_45 = arith.constant 0 : index
    %92 = vector.load %arg15[%91, %c0_45] : memref<64x16xf32, #tpu.memory_space<vmem>>, vector<8x16xf32>
    %93 = arith.mulf %92, %86 : vector<8x16xf32>
    %94 = arith.index_cast %90 : i32 to index
    %c0_46 = arith.constant 0 : index
    %95 = vector.load %arg16[%94, %c0_46] : memref<64x16xf32, #tpu.memory_space<vmem>>, vector<8x16xf32>
    %96 = arith.addf %93, %95 : vector<8x16xf32>
    %97 = arith.index_cast %90 : i32 to index
    %c0_47 = arith.constant 0 : index
    %98 = vector.load %arg16[%97, %c0_47] : memref<64x16xf32, #tpu.memory_space<vmem>>, vector<8x16xf32>
    tpu.vector_store %arg16[%97, %c0_47], %96 {strides = array<i32>} : memref<64x16xf32, #tpu.memory_space<vmem>>, vector<8x16xf32>,
    %c4_i32 = arith.constant 4 : i32
    %c8_i32_48 = arith.constant 8 : i32
    %99 = arith.muli %c4_i32, %c8_i32_48 : i32
    %100 = tpu.assume_multiple %99, 8 : i32
    %101 = arith.index_cast %100 : i32 to index
    %c0_49 = arith.constant 0 : index
    %102 = vector.load %arg15[%101, %c0_49] : memref<64x16xf32, #tpu.memory_space<vmem>>, vector<8x16xf32>
    %103 = arith.mulf %102, %96 : vector<8x16xf32>
    %104 = arith.index_cast %100 : i32 to index
    %c0_50 = arith.constant 0 : index
    %105 = vector.load %arg16[%104, %c0_50] : memref<64x16xf32, #tpu.memory_space<vmem>>, vector<8x16xf32>
    %106 = arith.addf %103, %105 : vector<8x16xf32>
    %107 = arith.index_cast %100 : i32 to index
    %c0_51 = arith.constant 0 : index
    %108 = vector.load %arg16[%107, %c0_51] : memref<64x16xf32, #tpu.memory_space<vmem>>, vector<8x16xf32>
    tpu.vector_store %arg16[%107, %c0_51], %106 {strides = array<i32>} : memref<64x16xf32, #tpu.memory_space<vmem>>, vector<8x16xf32>,
    %c5_i32 = arith.constant 5 : i32
    %c8_i32_52 = arith.constant 8 : i32
    %109 = arith.muli %c5_i32, %c8_i32_52 : i32
    %110 = tpu.assume_multiple %109, 8 : i32
    %111 = arith.index_cast %110 : i32 to index
    %c0_53 = arith.constant 0 : index
    %112 = vector.load %arg15[%111, %c0_53] : memref<64x16xf32, #tpu.memory_space<vmem>>, vector<8x16xf32>
    %113 = arith.mulf %112, %106 : vector<8x16xf32>
    %114 = arith.index_cast %110 : i32 to index
    %c0_54 = arith.constant 0 : index
    %115 = vector.load %arg16[%114, %c0_54] : memref<64x16xf32, #tpu.memory_space<vmem>>, vector<8x16xf32>
    %116 = arith.addf %113, %115 : vector<8x16xf32>
    %117 = arith.index_cast %110 : i32 to index
    %c0_55 = arith.constant 0 : index
    %118 = vector.load %arg16[%117, %c0_55] : memref<64x16xf32, #tpu.memory_space<vmem>>, vector<8x16xf32>
    tpu.vector_store %arg16[%117, %c0_55], %116 {strides = array<i32>} : memref<64x16xf32, #tpu.memory_space<vmem>>, vector<8x16xf32>,
    %c6_i32 = arith.constant 6 : i32
    %c8_i32_56 = arith.constant 8 : i32
    %119 = arith.muli %c6_i32, %c8_i32_56 : i32
    %120 = tpu.assume_multiple %119, 8 : i32
    %121 = arith.index_cast %120 : i32 to index
    %c0_57 = arith.constant 0 : index
    %122 = vector.load %arg15[%121, %c0_57] : memref<64x16xf32, #tpu.memory_space<vmem>>, vector<8x16xf32>
    %123 = arith.mulf %122, %116 : vector<8x16xf32>
    %124 = arith.index_cast %120 : i32 to index
    %c0_58 = arith.constant 0 : index
    %125 = vector.load %arg16[%124, %c0_58] : memref<64x16xf32, #tpu.memory_space<vmem>>, vector<8x16xf32>
    %126 = arith.addf %123, %125 : vector<8x16xf32>
    %127 = arith.index_cast %120 : i32 to index
    %c0_59 = arith.constant 0 : index
    %128 = vector.load %arg16[%127, %c0_59] : memref<64x16xf32, #tpu.memory_space<vmem>>, vector<8x16xf32>
    tpu.vector_store %arg16[%127, %c0_59], %126 {strides = array<i32>} : memref<64x16xf32, #tpu.memory_space<vmem>>, vector<8x16xf32>,
    %c7_i32 = arith.constant 7 : i32
    %c8_i32_60 = arith.constant 8 : i32
    %129 = arith.muli %c7_i32, %c8_i32_60 : i32
    %130 = tpu.assume_multiple %129, 8 : i32
    %131 = arith.index_cast %130 : i32 to index
    %c0_61 = arith.constant 0 : index
    %132 = vector.load %arg15[%131, %c0_61] : memref<64x16xf32, #tpu.memory_space<vmem>>, vector<8x16xf32>
    %133 = arith.mulf %132, %126 : vector<8x16xf32>
    %134 = arith.index_cast %130 : i32 to index
    %c0_62 = arith.constant 0 : index
    %135 = vector.load %arg16[%134, %c0_62] : memref<64x16xf32, #tpu.memory_space<vmem>>, vector<8x16xf32>
    %136 = arith.addf %133, %135 : vector<8x16xf32>
    %137 = arith.index_cast %130 : i32 to index
    %c0_63 = arith.constant 0 : index
    %138 = vector.load %arg16[%137, %c0_63] : memref<64x16xf32, #tpu.memory_space<vmem>>, vector<8x16xf32>
    tpu.vector_store %arg16[%137, %c0_63], %136 {strides = array<i32>} : memref<64x16xf32, #tpu.memory_space<vmem>>, vector<8x16xf32>,
    %c8_i32_64 = arith.constant 8 : i32
    %c0_65 = arith.constant 0 : index
    %c0_66 = arith.constant 0 : index
    %139 = vector.load %arg14[%c0_65, %c0_66] : memref<8x16xf32, #tpu.memory_space<vmem>>, vector<8x16xf32>
    tpu.vector_store %arg14[%c0_65, %c0_66], %136 {strides = array<i32>} : memref<8x16xf32, #tpu.memory_space<vmem>>, vector<8x16xf32>,
    %c0_67 = arith.constant 0 : index
    %c0_68 = arith.constant 0 : index
    %140 = vector.load %arg16[%c0_67, %c0_68] : memref<64x16xf32, #tpu.memory_space<vmem>>, vector<64x16xf32>
    %c0_69 = arith.constant 0 : index
    %c0_70 = arith.constant 0 : index
    %141 = vector.load %arg7[%c0_69, %c0_70] : memref<16x32xf32, #tpu.memory_space<vmem>>, vector<16x32xf32>
    %cst_71 = arith.constant dense<0.000000e+00> : vector<64x32xf32>
    %142 = tpu.matmul %140, %141, %cst_71 {dimension_numbers = #tpu.dot_dimension_numbers<[1], [0], [0], [1], [0, 0, 1, 1], [], []>} : vector<64x16xf32>, vector<16x32xf32>, vector<64x32xf32> -> vector<64x32xf32>
    %143 = vector.broadcast %7 : vector<1x32xf32> to vector<64x32xf32>
    %144 = arith.addf %142, %143 : vector<64x32xf32>
    %145 = vector.broadcast %6 : vector<1x32xf32> to vector<64x32xf32>
    %146 = arith.mulf %31, %145 : vector<64x32xf32>
    %147 = arith.addf %144, %146 : vector<64x32xf32>
    %c0_72 = arith.constant 0 : index
    %c0_73 = arith.constant 0 : index
    %148 = vector.load %arg8[%c0_72, %c0_73] : memref<32x32xf32, #tpu.memory_space<vmem>>, vector<32x32xf32>
    %cst_74 = arith.constant dense<0.000000e+00> : vector<64x32xf32>
    %149 = tpu.matmul %147, %148, %cst_74 {dimension_numbers = #tpu.dot_dimension_numbers<[1], [0], [0], [1], [0, 0, 1, 1], [], []>} : vector<64x32xf32>, vector<32x32xf32>, vector<64x32xf32> -> vector<64x32xf32>
    %150 = vector.broadcast %8 : vector<1x32xf32> to vector<64x32xf32>
    %151 = arith.addf %149, %150 : vector<64x32xf32>
    %152 = arith.addf %1, %151 : vector<64x32xf32>
    %cst_75 = arith.constant dense<0.000000e+00> : vector<64xf32>
    %153 = vector.multi_reduction <add>, %152, %cst_75 [1] : vector<64x32xf32> to vector<64xf32>
    %154 = vector.shape_cast %153 : vector<64xf32> to vector<64x1xf32>
    %cst_76 = arith.constant 3.200000e+01 : f32
    %155 = vector.broadcast %cst_76 : f32 to vector<64x1xf32>
    %156 = arith.divf %154, %155 : vector<64x1xf32>
    %157 = vector.broadcast %156 : vector<64x1xf32> to vector<64x32xf32>
    %158 = arith.subf %152, %157 : vector<64x32xf32>
    %159 = arith.mulf %158, %158 : vector<64x32xf32>
    %cst_77 = arith.constant dense<0.000000e+00> : vector<64xf32>
    %160 = vector.multi_reduction <add>, %159, %cst_77 [1] : vector<64x32xf32> to vector<64xf32>
    %161 = vector.shape_cast %160 : vector<64xf32> to vector<64x1xf32>
    %cst_78 = arith.constant 3.200000e+01 : f32
    %162 = vector.broadcast %cst_78 : f32 to vector<64x1xf32>
    %163 = arith.divf %161, %162 : vector<64x1xf32>
    %164 = vector.broadcast %156 : vector<64x1xf32> to vector<64x32xf32>
    %165 = arith.subf %152, %164 : vector<64x32xf32>
    %cst_79 = arith.constant 9.99999974E-6 : f32
    %166 = vector.broadcast %cst_79 : f32 to vector<64x1xf32>
    %167 = arith.addf %163, %166 : vector<64x1xf32>
    %168 = math.rsqrt %167 : vector<64x1xf32>
    %169 = vector.broadcast %168 : vector<64x1xf32> to vector<64x32xf32>
    %170 = arith.mulf %165, %169 : vector<64x32xf32>
    %171 = vector.broadcast %4 : vector<1x32xf32> to vector<64x32xf32>
    %172 = arith.mulf %170, %171 : vector<64x32xf32>
    %173 = vector.broadcast %5 : vector<1x32xf32> to vector<64x32xf32>
    %174 = arith.addf %172, %173 : vector<64x32xf32>
    %c0_80 = arith.constant 0 : index
    %c0_81 = arith.constant 0 : index
    %175 = vector.load %arg9[%c0_80, %c0_81] : memref<32x64xf32, #tpu.memory_space<vmem>>, vector<32x64xf32>
    %cst_82 = arith.constant dense<0.000000e+00> : vector<64x64xf32>
    %176 = tpu.matmul %174, %175, %cst_82 {dimension_numbers = #tpu.dot_dimension_numbers<[1], [0], [0], [1], [0, 0, 1, 1], [], []>} : vector<64x32xf32>, vector<32x64xf32>, vector<64x64xf32> -> vector<64x64xf32>
    %c0_83 = arith.constant 0 : index
    %c0_84 = arith.constant 0 : index
    %177 = vector.load %arg11[%c0_83, %c0_84] : memref<2x64xf32, #tpu.memory_space<vmem>>, vector<1x64xf32>
    %178 = vector.broadcast %177 : vector<1x64xf32> to vector<64x64xf32>
    %179 = arith.addf %176, %178 : vector<64x64xf32>
    %c0_85 = arith.constant 0 : index
    %c0_86 = arith.constant 0 : index
    %180 = vector.load %arg10[%c0_85, %c0_86] : memref<32x64xf32, #tpu.memory_space<vmem>>, vector<32x64xf32>
    %cst_87 = arith.constant dense<0.000000e+00> : vector<64x64xf32>
    %181 = tpu.matmul %174, %180, %cst_87 {dimension_numbers = #tpu.dot_dimension_numbers<[1], [0], [0], [1], [0, 0, 1, 1], [], []>} : vector<64x32xf32>, vector<32x64xf32>, vector<64x64xf32> -> vector<64x64xf32>
    %c1_88 = arith.constant 1 : index
    %c0_89 = arith.constant 0 : index
    %182 = vector.load %arg11[%c1_88, %c0_89] : memref<2x64xf32, #tpu.memory_space<vmem>>, vector<1x64xf32>
    %183 = vector.broadcast %182 : vector<1x64xf32> to vector<64x64xf32>
    %184 = arith.addf %181, %183 : vector<64x64xf32>
    %185 = arith.negf %184 : vector<64x64xf32>
    %186 = math.exp %185 : vector<64x64xf32>
    %cst_90 = arith.constant 1.000000e+00 : f32
    %187 = vector.broadcast %cst_90 : f32 to vector<64x64xf32>
    %188 = arith.addf %187, %186 : vector<64x64xf32>
    %189 = arith.divf %187, %188 : vector<64x64xf32>
    %190 = arith.mulf %184, %189 : vector<64x64xf32>
    %191 = arith.mulf %179, %190 : vector<64x64xf32>
    %c0_91 = arith.constant 0 : index
    %c0_92 = arith.constant 0 : index
    %192 = vector.load %arg12[%c0_91, %c0_92] : memref<64x32xf32, #tpu.memory_space<vmem>>, vector<64x32xf32>
    %cst_93 = arith.constant dense<0.000000e+00> : vector<64x32xf32>
    %193 = tpu.matmul %191, %192, %cst_93 {dimension_numbers = #tpu.dot_dimension_numbers<[1], [0], [0], [1], [0, 0, 1, 1], [], []>} : vector<64x64xf32>, vector<64x32xf32>, vector<64x32xf32> -> vector<64x32xf32>
    %194 = vector.broadcast %9 : vector<1x32xf32> to vector<64x32xf32>
    %195 = arith.addf %193, %194 : vector<64x32xf32>
    %196 = arith.addf %152, %195 : vector<64x32xf32>
    %197 = vector.shape_cast %196 : vector<64x32xf32> to vector<8x8x32xf32>
    %c0_94 = arith.constant 0 : index
    %c0_95 = arith.constant 0 : index
    %c0_96 = arith.constant 0 : index
    %198 = vector.load %arg13[%c0_94, %c0_95, %c0_96] : memref<8x8x32xf32, #tpu.memory_space<vmem>>, vector<8x8x32xf32>
    tpu.vector_store %arg13[%c0_94, %c0_95, %c0_96], %197 {strides = array<i32>} : memref<8x8x32xf32, #tpu.memory_space<vmem>>, vector<8x8x32xf32>,
    return
  }
  func.func @transform_0(%arg0: i32, %arg1: i32) -> (i32, i32, i32) {
    %c0_i32 = arith.constant 0 : i32
    %c0_i32_0 = arith.constant 0 : i32
    return %arg1, %arg0, %c0_i32 : i32, i32, i32
  }
  func.func @transform_1(%arg0: i32, %arg1: i32) -> (i32, i32) {
    %c0_i32 = arith.constant 0 : i32
    %c0_i32_0 = arith.constant 0 : i32
    %c0_i32_1 = arith.constant 0 : i32
    return %c0_i32, %c0_i32_0 : i32, i32
  }
  func.func @transform_2(%arg0: i32, %arg1: i32) -> (i32, i32) {
    %c0_i32 = arith.constant 0 : i32
    %c0_i32_0 = arith.constant 0 : i32
    %c0_i32_1 = arith.constant 0 : i32
    return %c0_i32, %c0_i32_0 : i32, i32
  }
  func.func @transform_3(%arg0: i32, %arg1: i32) -> (i32, i32) {
    %c0_i32 = arith.constant 0 : i32
    %c0_i32_0 = arith.constant 0 : i32
    %c0_i32_1 = arith.constant 0 : i32
    return %c0_i32, %c0_i32_0 : i32, i32
  }
  func.func @transform_4(%arg0: i32, %arg1: i32) -> (i32, i32) {
    %c0_i32 = arith.constant 0 : i32
    %c0_i32_0 = arith.constant 0 : i32
    %c0_i32_1 = arith.constant 0 : i32
    return %c0_i32, %c0_i32_0 : i32, i32
  }
  func.func @transform_5(%arg0: i32, %arg1: i32) -> (i32, i32) {
    %c0_i32 = arith.constant 0 : i32
    %c0_i32_0 = arith.constant 0 : i32
    %c0_i32_1 = arith.constant 0 : i32
    return %c0_i32, %c0_i32_0 : i32, i32
  }
  func.func @transform_6(%arg0: i32, %arg1: i32) -> (i32, i32) {
    %c0_i32 = arith.constant 0 : i32
    %c0_i32_0 = arith.constant 0 : i32
    %c0_i32_1 = arith.constant 0 : i32
    return %c0_i32, %c0_i32_0 : i32, i32
  }
  func.func @transform_7(%arg0: i32, %arg1: i32) -> (i32, i32) {
    %c0_i32 = arith.constant 0 : i32
    %c0_i32_0 = arith.constant 0 : i32
    %c0_i32_1 = arith.constant 0 : i32
    return %c0_i32, %c0_i32_0 : i32, i32
  }
  func.func @transform_8(%arg0: i32, %arg1: i32) -> (i32, i32) {
    %c0_i32 = arith.constant 0 : i32
    %c0_i32_0 = arith.constant 0 : i32
    %c0_i32_1 = arith.constant 0 : i32
    return %c0_i32, %c0_i32_0 : i32, i32
  }
  func.func @transform_9(%arg0: i32, %arg1: i32) -> (i32, i32) {
    %c0_i32 = arith.constant 0 : i32
    %c0_i32_0 = arith.constant 0 : i32
    %c0_i32_1 = arith.constant 0 : i32
    return %c0_i32, %c0_i32_0 : i32, i32
  }
  func.func @transform_10(%arg0: i32, %arg1: i32) -> (i32, i32) {
    %c0_i32 = arith.constant 0 : i32
    %c0_i32_0 = arith.constant 0 : i32
    %c0_i32_1 = arith.constant 0 : i32
    return %c0_i32, %c0_i32_0 : i32, i32
  }
  func.func @transform_11(%arg0: i32, %arg1: i32) -> (i32, i32, i32) {
    %c0_i32 = arith.constant 0 : i32
    %c0_i32_0 = arith.constant 0 : i32
    return %arg1, %arg0, %c0_i32 : i32, i32, i32
  }
}

</mosaic_0001>

<bundles_post_ra>
// kernel: mamba_block.1
= control target key start
LH: loop header
LB: loop body
LE: loop exit
PB: predicated region body
PF: predicated region fallthrough
CT: control target
= control target key end

     0   :  { %vm54_vm0 = vcmask 261120   ;;  %v1599_v16 = vmov 32.0   ;;  %s2367_s0 = inlined_call_operand.vmem [shape: f32[8,8,32], index: 0, kind: input, shape index: {}]   ;;  %s2368_s1 = inlined_call_operand.vmem [shape: f32[8,32], index: 1, kind: input, shape index: {}]   ;;  %s2369_s4 = inlined_call_operand.vmem [shape: f32[1,17], index: 4, kind: input, shape index: {}]   ;;  %s2370_s3 = inlined_call_operand.vmem [shape: f32[32,17], index: 3, kind: input, shape index: {}]   ;;  %s2371_s2 = inlined_call_operand.vmem [shape: f32[1,16], index: 2, kind: input, shape index: {}]   ;;  %s2372_s5 = inlined_call_operand.vmem [shape: f32[16,32], index: 5, kind: input, shape index: {}]   ;;  %s2373_s6 = inlined_call_operand.vmem [shape: f32[32,32], index: 6, kind: input, shape index: {}]   ;;  %s2374_s7 = inlined_call_operand.vmem [shape: f32[32,64], index: 7, kind: input, shape index: {}]   ;;  %s2375_s8 = inlined_call_operand.vmem [shape: f32[32,64], index: 8, kind: input, shape index: {}]   ;;  %s2376_s9 = inlined_call_operand.vmem [shape: f32[2,64], index: 9, kind: input, shape index: {}]   ;;  %s2377_s10 = inlined_call_operand.vmem [shape: f32[64,32], index: 10, kind: input, shape index: {}]   ;;  %s2378_s11 = inlined_call_operand.vmem [shape: f32[8,8,32], index: 11, kind: output, shape index: {}]  }
   0x1   :  { %v41_v0 = vld [vmem:[%s2367_s0 + $0x18] sm:$0xff]  ;;  %v40_v1 = vld [vmem:[%s2367_s0 + $0x10] sm:$0xff]  ;;  %v38_v2 = vld [vmem:[%s2367_s0] sm:$0xff]  ;;  %1477 = vrcp.f32 %v1599_v16 }
   0x2   :  { %v64_v3 = vsel %vm54_vm0, %v41_v0, 0.0  ;;  %v61_v4 = vsel %vm54_vm0, %v40_v1, 0.0  ;;  %v55_v5 = vsel %vm54_vm0, %v38_v2, 0.0  ;;  %v43_v6 = vld [vmem:[%s2367_s0 + $0x28] sm:$0xff]  ;;  %v42_v7 = vld [vmem:[%s2367_s0 + $0x20] sm:$0xff]  ;;  %v45_v12 = vld [vmem:[%s2367_s0 + $0x38] sm:$0xff] }
   0x3   :  { %65 = vadd.xlane.f32.xlu2 %v64_v3  ;;  %62 = vadd.xlane.f32.xlu1 %v61_v4  ;;  %v39_v8 = vld [vmem:[%s2367_s0 + $0x8] sm:$0xff]  ;;  %v70_v9 = vsel %vm54_vm0, %v43_v6, 0.0  ;;  %v67_v10 = vsel %vm54_vm0, %v42_v7, 0.0  ;;  %v44_v13 = vld [vmem:[%s2367_s0 + $0x30] sm:$0xff]  ;;  %v76_v14 = vsel %vm54_vm0, %v45_v12, 0.0  ;;  %v259_v63 = vld [vmem:[%s2370_s3 + $0x18] sm:$0xff] }
   0x4   :  { %56 = vadd.xlane.f32.xlu0 %v55_v5  ;;  %v58_v11 = vsel %vm54_vm0, %v39_v8, 0.0  ;;  %v73_v15 = vsel %vm54_vm0, %v44_v13, 0.0  ;;  %300 = vmatpush.msra.mxu0 %v259_v63 }
   0x5   :  { %1453 = vmatpush.msra.mxu2 %v259_v63 }
   0x7   :  { %v1478_v17 = vpop.eup %1477 }
   0x8   :  { %v80_v18 = vmul.f32 32.0, %v1478_v17  ;;  %vm84_vm1 = vweird.f32 %v1478_v17 }
   0xa   :  { %v81_v19 = vsub.f32 1.0, %v80_v18 }
   0xb   :  { %71 = vadd.xlane.f32.xlu2 %v70_v9  ;;  %68 = vadd.xlane.f32.xlu1 %v67_v10 }
   0xc   :  { %59 = vadd.xlane.f32.xlu0 %v58_v11  ;;  %v82_v20 = vmul.f32 %v1478_v17, %v81_v19 }
   0xe   :  { %v83_v21 = vadd.f32 %v1478_v17, %v82_v20 }
  0x10   :  { %v1694_v22 = vsel %vm84_vm1, %v1478_v17, %v83_v21 }
  0x13   :  { %77 = vadd.xlane.f32.xlu1 %v76_v14 }
  0x14   :  { %74 = vadd.xlane.f32.xlu0 %v73_v15 }
  0x76   :  { %v66_v23 = vpop.xlane.xlu2 %65  ;;  %v63_v24 = vpop.xlane.xlu1 %62 }
  0x77   :  { %v88_v25 = vmul.f32 %v1694_v22, %v63_v24  ;;  %v57_v26 = vpop.xlane.xlu0 %56  ;;  %v89_v33 = vmul.f32 %v1694_v22, %v66_v23 }
  0x78   :  { %v86_v27 = vmul.f32 %v1694_v22, %v57_v26 }
  0x79   :  { %v1698_v28 = vsub.f32 %v40_v1, %v88_v25  ;;  %v1716_v43 = vsub.f32 %v41_v0, %v89_v33  ;;  %v258_v0 = vld [vmem:[%s2370_s3 + $0x10] sm:$0xff]  ;;  %v257_v1 = vld [vmem:[%s2370_s3 + $0x8] sm:$0xff] }
  0x7a   :  { %v1700_v29 = vsub.f32 %v38_v2, %v86_v27  ;;  %301 = vmatpush.msra.mxu0 %v258_v0  ;;  %1454 = vmatpush.msra.mxu2 %v258_v0  ;;  %v256_v2 = vld [vmem:[%s2370_s3] sm:$0xff] }
  0x7b   :  { %v104_v30 = vmul.f32 %v1698_v28, %v1698_v28  ;;  %v105_v52 = vmul.f32 %v1716_v43, %v1716_v43 }
  0x7c   :  { %v102_v31 = vmul.f32 %v1700_v29, %v1700_v29  ;;  %302 = vmatpush.msra.mxu0 %v257_v1  ;;  %1455 = vmatpush.msra.mxu2 %v257_v1 }
  0x7d   :  { %v116_v32 = vsel %vm54_vm0, %v104_v30, 0.0  ;;  %v119_v57 = vsel %vm54_vm0, %v105_v52, 0.0 }
  0x7e   :  { %v72_v34 = vpop.xlane.xlu2 %71  ;;  %117 = vadd.xlane.f32.xlu1 %v116_v32  ;;  %v69_v35 = vpop.xlane.xlu1 %68  ;;  %v110_v36 = vsel %vm54_vm0, %v102_v31, 0.0  ;;  %303 = vmatpush.msra.mxu0 %v256_v2 }
  0x7f   :  { %v91_v37 = vmul.f32 %v1694_v22, %v72_v34  ;;  %v90_v38 = vmul.f32 %v1694_v22, %v69_v35  ;;  %111 = vadd.xlane.f32.xlu2 %v110_v36  ;;  %v60_v39 = vpop.xlane.xlu0 %59  ;;  %1456 = vmatpush.msra.mxu2 %v256_v2 }
  0x80   :  { %v87_v40 = vmul.f32 %v1694_v22, %v60_v39 }
  0x81   :  { %v1712_v41 = vsub.f32 %v43_v6, %v91_v37  ;;  %v1714_v42 = vsub.f32 %v42_v7, %v90_v38 }
  0x82   :  { %v1718_v44 = vsub.f32 %v39_v8, %v87_v40 }
  0x83   :  { %v107_v45 = vmul.f32 %v1712_v41, %v1712_v41  ;;  %v106_v46 = vmul.f32 %v1714_v42, %v1714_v42 }
  0x84   :  { %v103_v47 = vmul.f32 %v1718_v44, %v1718_v44 }
  0x85   :  { %v125_v48 = vsel %vm54_vm0, %v107_v45, 0.0  ;;  %v122_v49 = vsel %vm54_vm0, %v106_v46, 0.0 }
  0x86   :  { %126 = vadd.xlane.f32.xlu1 %v125_v48  ;;  %v113_v50 = vsel %vm54_vm0, %v103_v47, 0.0  ;;  %v78_v51 = vpop.xlane.xlu1 %77 }
  0x87   :  { %123 = vadd.xlane.f32.xlu2 %v122_v49  ;;  %114 = vadd.xlane.f32.xlu0 %v113_v50  ;;  %v75_v53 = vpop.xlane.xlu0 %74  ;;  %v93_v55 = vmul.f32 %v1694_v22, %v78_v51  ;;  %v1793_v51 = vld [vmem:[%s2368_s1] ss:$0 sm:$0xff] }
  0x88   :  { %v92_v54 = vmul.f32 %v1694_v22, %v75_v53 }
  0x89   :  { %v1736_v58 = vsub.f32 %v45_v12, %v93_v55 }
  0x8a   :  { %v1733_v56 = vsub.f32 %v44_v13, %v92_v54 }
  0x8b   :  { %v109_v61 = vmul.f32 %v1736_v58, %v1736_v58 }
  0x8c   :  { %v108_v59 = vmul.f32 %v1733_v56, %v1733_v56 }
  0x8d   :  { %v131_v62 = vsel %vm54_vm0, %v109_v61, 0.0 }
  0x8e   :  { %v128_v60 = vsel %vm54_vm0, %v108_v59, 0.0 }
  0x8f   :  { %120 = vadd.xlane.f32.xlu0 %v119_v57  ;;  %129 = vadd.xlane.f32.xlu2 %v128_v60  ;;  %v1800_v60 = vld [vmem:[%s2368_s1 + $0x1] ss:$0 sm:$0xff] }
  0x97   :  { %132 = vadd.xlane.f32.xlu0 %v131_v62 }
  0xf1   :  { %v118_v3 = vpop.xlane.xlu1 %117 }
  0xf2   :  { %v136_v4 = vmul.f32 %v118_v3, %v1694_v22  ;;  %v112_v5 = vpop.xlane.xlu2 %111 }
  0xf3   :  { %v134_v6 = vmul.f32 %v112_v5, %v1694_v22 }
  0xf4   :  { %v1758_v7 = vadd.f32 1e-05, %v136_v4 }
  0xf5   :  { %v142_v8 = vadd.f32 1e-05, %v134_v6 }
  0xf6   :  { %1479 = vrsqrt.f32 %v1758_v7  ;;  %vm176_vm11 = vweird.f32 %v1758_v7 }
  0xf7   :  { %1481 = vrsqrt.f32 %v142_v8  ;;  %vm156_vm3 = vweird.f32 %v142_v8 }
  0xf9   :  { %v127_v9 = vpop.xlane.xlu1 %126 }
  0xfa   :  { %v139_v10 = vmul.f32 %v127_v9, %v1694_v22  ;;  %v124_v11 = vpop.xlane.xlu2 %123  ;;  %v115_v12 = vpop.xlane.xlu0 %114 }
  0xfb   :  { %v138_v13 = vmul.f32 %v124_v11, %v1694_v22  ;;  %v135_v14 = vmul.f32 %v115_v12, %v1694_v22 }
  0xfc   :  { %v1764_v15 = vpop.eup %1479  ;;  %v1766_v16 = vadd.f32 1e-05, %v139_v10 }
  0xfd   :  { %v1482_v17 = vpop.eup %1481  ;;  %v146_v18 = vadd.f32 1e-05, %v138_v13  ;;  %v143_v19 = vadd.f32 1e-05, %v135_v14  ;;  %v171_v20 = vmul.f32 %v1764_v15, %v1758_v7  ;;  %vm177_vm12 = vweird.f32 %v1764_v15 }
  0xfe   :  { %v151_v21 = vmul.f32 %v1482_v17, %v142_v8  ;;  %1483 = vrsqrt.f32 %v1766_v16  ;;  %vm157_vm2 = vweird.f32 %v1482_v17  ;;  %vm206_vm9 = vweird.f32 %v1766_v16  ;;  %vm1834_vm1 = vmor %vm176_vm11, %vm177_vm12 }
  0xff   :  { %1485 = vrsqrt.f32 %v146_v18  ;;  %v172_v24 = vmul.f32 %v1764_v15, %v171_v20  ;;  %vm1782_vm4 = vmor %vm156_vm3, %vm157_vm2  ;;  %vm196_vm5 = vweird.f32 %v146_v18  ;;  %vm166_vm6 = vweird.f32 %v143_v19 }
 0x100   :  { %v152_v23 = vmul.f32 %v1482_v17, %v151_v21  ;;  %1487 = vrsqrt.f32 %v143_v19  ;;  %vm565_vm11 = vcmask 130048  }
 0x101   :  { %v173_v38 = vmul.f32 0.5, %v172_v24 }
 0x102   :  { %v153_v25 = vmul.f32 0.5, %v152_v23  ;;  %v130_v26 = vpop.xlane.xlu2 %129  ;;  %v121_v27 = vpop.xlane.xlu0 %120 }
 0x103   :  { %v140_v30 = vmul.f32 %v130_v26, %v1694_v22  ;;  %v137_v31 = vmul.f32 %v121_v27, %v1694_v22  ;;  %v174_v54 = vsub.f32 1.5, %v173_v38 }
 0x104   :  { %v1774_v32 = vpop.eup %1483  ;;  %v154_v33 = vsub.f32 1.5, %v153_v25 }
 0x105   :  { %v1486_v34 = vpop.eup %1485  ;;  %v201_v35 = vmul.f32 %v1774_v32, %v1766_v16  ;;  %v1778_v36 = vadd.f32 1e-05, %v140_v30  ;;  %v1780_v45 = vadd.f32 1e-05, %v137_v31  ;;  %vm207_vm10 = vweird.f32 %v1774_v32 }
 0x106   :  { %v1488_v37 = vpop.eup %1487  ;;  %v155_v39 = vmul.f32 %v1482_v17, %v154_v33  ;;  %v191_v40 = vmul.f32 %v1486_v34, %v146_v18  ;;  %vm197_vm7 = vweird.f32 %v1486_v34  ;;  %v175_v11 = vmul.f32 %v1764_v15, %v174_v54  ;;  %vm1827_vm15 = vmor %vm206_vm9, %vm207_vm10 }
 0x107   :  { %v202_v47 = vmul.f32 %v1774_v32, %v201_v35  ;;  %v161_v48 = vmul.f32 %v1488_v37, %v143_v19  ;;  %1489 = vrsqrt.f32 %v1778_v36  ;;  %vm167_vm8 = vweird.f32 %v1488_v37  ;;  %vm1809_vm13 = vmor %vm196_vm5, %vm197_vm7 }
 0x108   :  { %v159_v49 = vsel %vm1782_vm4, %v1482_v17, %v155_v39  ;;  %v192_v50 = vmul.f32 %v1486_v34, %v191_v40  ;;  %1491 = vrsqrt.f32 %v1780_v45  ;;  %vm1815_vm14 = vmor %vm166_vm6, %vm167_vm8  ;;  %v179_v25 = vsel %vm1834_vm1, %v1764_v15, %v175_v11 }
 0x109   :  { %v203_v52 = vmul.f32 0.5, %v202_v47  ;;  %v162_v53 = vmul.f32 %v1488_v37, %v161_v48  ;;  %v230_v59 = vmul.f32 %v159_v49, %v1700_v29  ;;  %vm216_vm2 = vweird.f32 %v1778_v36 }
 0x10a   :  { %v193_v55 = vmul.f32 0.5, %v192_v50  ;;  %v133_v57 = vpop.xlane.xlu0 %132  ;;  %vm186_vm4 = vweird.f32 %v1780_v45  ;;  %v232_v35 = vmul.f32 %v179_v25, %v1698_v28 }
 0x10b   :  { %v204_v61 = vsub.f32 1.5, %v203_v52  ;;  %v163_v62 = vmul.f32 0.5, %v162_v53  ;;  %v141_v63 = vmul.f32 %v133_v57, %v1694_v22  ;;  %v239_v1 = vmul.f32 %v1793_v51, %v230_v59 }
 0x10c   :  { %v194_v0 = vsub.f32 1.5, %v193_v55  ;;  %v241_v46 = vmul.f32 %v1793_v51, %v232_v35 }
 0x10d   :  { %v164_v2 = vsub.f32 1.5, %v163_v62  ;;  %v149_v3 = vadd.f32 1e-05, %v141_v63  ;;  %v1490_v4 = vpop.eup %1489  ;;  %v205_v5 = vmul.f32 %v1774_v32, %v204_v61  ;;  %v1820_v9 = vadd.f32 %v1800_v60, %v239_v1 }
 0x10e   :  { %v195_v6 = vmul.f32 %v1486_v34, %v194_v0  ;;  %v1492_v10 = vpop.eup %1491  ;;  %v211_v14 = vmul.f32 %v1490_v4, %v1778_v36  ;;  %vm217_vm3 = vweird.f32 %v1490_v4  ;;  %v1886_v52 = vadd.f32 %v1800_v60, %v241_v46 }
 0x10f   :  { %v165_v13 = vmul.f32 %v1488_v37, %v164_v2  ;;  %v181_v19 = vmul.f32 %v1492_v10, %v1780_v45  ;;  %1493 = vrsqrt.f32 %v149_v3  ;;  %1389 = vmatmul.msk.f32.vlgmr.msra.gmra.mxu0 %vm54_vm0, %v1820_v9  ;;  %v209_v7 = vsel %vm1827_vm15, %v1774_v32, %v205_v5  ;;  %vm1867_vm6 = vmor %vm216_vm2, %vm217_vm3 }
 0x110   :  { %v199_v18 = vsel %vm1809_vm13, %v1486_v34, %v195_v6  ;;  %v212_v20 = vmul.f32 %v1490_v4, %v211_v14  ;;  %vm187_vm5 = vweird.f32 %v1492_v10  ;;  %vm226_vm8 = vweird.f32 %v149_v3 }
 0x111   :  { %v169_v16 = vsel %vm1815_vm14, %v1488_v37, %v165_v13  ;;  %v234_v21 = vmul.f32 %v199_v18, %v1714_v42  ;;  %v182_v23 = vmul.f32 %v1492_v10, %v181_v19  ;;  %vm188_vm7 = vmor %vm186_vm4, %vm187_vm5  ;;  %v1600_v2 = vmov 16  }
 0x112   :  { %v231_v24 = vmul.f32 %v169_v16, %v1718_v44  ;;  %v213_v26 = vmul.f32 0.5, %v212_v20  ;;  %v235_v44 = vmul.f32 %v209_v7, %v1712_v41  ;;  %1462 = vset.pattern.permute.xlu1 %v1600_v2  ;;  %1463 = vset.pattern.permute.xlu2 %v1600_v2 }
 0x113   :  { %v243_v27 = vmul.f32 %v1793_v51, %v234_v21  ;;  %v183_v30 = vmul.f32 0.5, %v182_v23  ;;  %1464 = vset.pattern.permute.xlu0 %v1600_v2 }
 0x114   :  { %v240_v42 = vmul.f32 %v1793_v51, %v231_v24  ;;  %v214_v31 = vsub.f32 1.5, %v213_v26  ;;  %v244_v28 = vmul.f32 %v1793_v51, %v235_v44 }
 0x115   :  { %v1858_v32 = vadd.f32 %v1800_v60, %v243_v27  ;;  %v1494_v33 = vpop.eup %1493  ;;  %v184_v15 = vsub.f32 1.5, %v183_v30 }
 0x116   :  { %v1862_v34 = vadd.f32 %v1800_v60, %v240_v42  ;;  %v215_v37 = vmul.f32 %v1490_v4, %v214_v31  ;;  %v221_v39 = vmul.f32 %v1494_v33, %v149_v3  ;;  %vm227_vm9 = vweird.f32 %v1494_v33 }
 0x117   :  { %1393 = vmatmul.msk.f32.vlgmr.msra.gmra.mxu2 %vm54_vm0, %v1858_v32  ;;  %v185_v40 = vmul.f32 %v1492_v10, %v184_v15  ;;  %v1882_v50 = vadd.f32 %v1800_v60, %v244_v28  ;;  %vm228_vm10 = vmor %vm226_vm8, %vm227_vm9 }
 0x118   :  { %1390 = vmatmul.msk.f32.gmra.mxu0 %vm54_vm0, %v1862_v34  ;;  %v222_v41 = vmul.f32 %v1494_v33, %v221_v39  ;;  %v219_v36 = vsel %vm1867_vm6, %v1490_v4, %v215_v37 }
 0x119   :  { %v189_v47 = vsel %vm188_vm7, %v1492_v10, %v185_v40  ;;  %v236_v45 = vmul.f32 %v219_v36, %v1733_v56 }
 0x11a   :  { %v223_v48 = vmul.f32 0.5, %v222_v41  ;;  %v233_v53 = vmul.f32 %v189_v47, %v1716_v43 }
 0x11b   :  { %v245_v55 = vmul.f32 %v1793_v51, %v236_v45 }
 0x11c   :  { %v224_v49 = vsub.f32 1.5, %v223_v48  ;;  %v242_v59 = vmul.f32 %v1793_v51, %v233_v53 }
 0x11d   :  { %v1896_v56 = vadd.f32 %v1800_v60, %v245_v55 }
 0x11e   :  { %v225_v54 = vmul.f32 %v1494_v33, %v224_v49  ;;  %v1900_v43 = vadd.f32 %v1800_v60, %v242_v59 }
 0x11f   :  { %1394 = vmatmul.msk.f32.gmra.mxu2 %vm54_vm0, %v1882_v50 }
 0x120   :  { %1391 = vmatmul.msk.f32.gmra.mxu0 %vm54_vm0, %v1886_v52  ;;  %v229_v57 = vsel %vm228_vm10, %v1494_v33, %v225_v54 }
 0x121   :  { %v237_v61 = vmul.f32 %v229_v57, %v1736_v58  ;;  %v1915_v58 = vld [vmem:[%s2369_s4] ss:$0 sm:$0xff] }
 0x123   :  { %v246_v62 = vmul.f32 %v1793_v51, %v237_v61 }
 0x125   :  { %v1908_v63 = vadd.f32 %v1800_v60, %v246_v62 }
 0x127   :  { %1395 = vmatmul.msk.f32.gmra.mxu2 %vm54_vm0, %v1896_v56 }
 0x128   :  { %1392 = vmatmul.msk.f32.gmra.mxu0 %vm54_vm0, %v1900_v43 }
 0x12f   :  { %1396 = vmatmul.msk.f32.gmra.mxu2 %vm54_vm0, %v1908_v63 }
 0x18c   :  { %v305_v0 = vpop.f32.mrf.mxu0 }
 0x18d   :  { %v306_v1 = vadd.f32 %v1915_v58, %v305_v0 }
 0x18f   :  { %v1397_v29 = vmul.f32 -1.442695, %v306_v1  ;;  %574 = vst.msk [vmem:[#allocation4] sm:$0xff] %vm565_vm11, %v306_v1 }
 0x191   :  { %1495 = vpow2.f32 %v1397_v29 }
 0x195   :  { %v308_v51 = vpop.f32.mrf.mxu0 }
 0x196   :  { %v309_v60 = vadd.f32 %v1915_v58, %v308_v51 }
 0x197   :  { %v1496_v3 = vpop.eup %1495 }
 0x198   :  { %v1398_v4 = vmul.f32 -1.442695, %v309_v60  ;;  %575 = vst.msk [vmem:[#allocation4 + $0x8] sm:$0xff] %vm565_vm11, %v309_v60  ;;  %v353_v5 = vadd.f32 1.0, %v1496_v3 }
 0x19a   :  { %1497 = vpow2.f32 %v1398_v4  ;;  %v317_v6 = vpop.f32.mrf.mxu2  ;;  %v370_v25 = vand.u32 2147483647, %v353_v5  ;;  %v372_v26 = vand.u32 2147483648, %v353_v5  ;;  %vm366_vm13 = vweird.f32 %v353_v5 }
 0x19b   :  { %1499 = vrcp.f32 %v353_v5  ;;  %v318_v8 = vadd.f32 %v1915_v58, %v317_v6 }
 0x19c   :  { %v373_v37 = vor.u32 1.1754944e-38, %v372_v26  ;;  %vm371_vm15 = vcmp.eq.f32.partialorder %v370_v25, 8.507059e+37 }
 0x19d   :  { %v1401_v10 = vmul.f32 -1.442695, %v318_v8  ;;  %578 = vst.msk [vmem:[#allocation4 + $0x20] sm:$0xff] %vm565_vm11, %v318_v8  ;;  %v311_v11 = vpop.f32.mrf.mxu0 }
 0x19e   :  { %v312_v12 = vadd.f32 %v1915_v58, %v311_v11 }
 0x19f   :  { %1501 = vpow2.f32 %v1401_v10 }
 0x1a0   :  { %v1498_v13 = vpop.eup %1497  ;;  %v1399_v14 = vmul.f32 -1.442695, %v312_v12  ;;  %576 = vst.msk [vmem:[#allocation4 + $0x10] sm:$0xff] %vm565_vm11, %v312_v12 }
 0x1a1   :  { %v1500_v17 = vpop.eup %1499  ;;  %v354_v18 = vadd.f32 1.0, %v1498_v13 }
 0x1a2   :  { %1503 = vpow2.f32 %v1399_v14  ;;  %v320_v19 = vpop.f32.mrf.mxu2  ;;  %v362_v16 = vmul.f32 %v1500_v17, %v353_v5  ;;  %vm367_vm12 = vweird.f32 %v1500_v17 }
 0x1a3   :  { %1505 = vrcp.f32 %v354_v18  ;;  %v321_v20 = vadd.f32 %v1915_v58, %v320_v19  ;;  %vm368_vm14 = vmor %vm366_vm13, %vm367_vm12  ;;  %v385_v49 = vand.u32 2147483647, %v354_v18  ;;  %v387_v45 = vand.u32 2147483648, %v354_v18 }
 0x1a4   :  { %v363_v21 = vsub.f32 1.0, %v362_v16  ;;  %vm381_vm2 = vweird.f32 %v354_v18 }
 0x1a5   :  { %v1502_v7 = vpop.eup %1501  ;;  %v1402_v23 = vmul.f32 -1.442695, %v321_v20  ;;  %579 = vst.msk [vmem:[#allocation4 + $0x28] sm:$0xff] %vm565_vm11, %v321_v20  ;;  %v314_v24 = vpop.f32.mrf.mxu0  ;;  %vm386_vm4 = vcmp.eq.f32.partialorder %v385_v49, 8.507059e+37  ;;  %v388_v2 = vor.u32 1.1754944e-38, %v387_v45 }
 0x1a6   :  { %v1927_v27 = vadd.f32 1.0, %v1502_v7  ;;  %v315_v30 = vadd.f32 %v1915_v58, %v314_v24  ;;  %v364_v42 = vmul.f32 %v1500_v17, %v363_v21 }
 0x1a7   :  { %1507 = vpow2.f32 %v1402_v23 }
 0x1a8   :  { %v1504_v31 = vpop.eup %1503  ;;  %1509 = vrcp.f32 %v1927_v27  ;;  %v1400_v44 = vmul.f32 -1.442695, %v315_v30  ;;  %577 = vst.msk [vmem:[#allocation4 + $0x18] sm:$0xff] %vm565_vm11, %v315_v30  ;;  %v365_v33 = vadd.f32 %v1500_v17, %v364_v42  ;;  %v432_v0 = vand.u32 2147483648, %v1927_v27 }
 0x1a9   :  { %v1506_v15 = vpop.eup %1505  ;;  %v1932_v35 = vadd.f32 1.0, %v1504_v31  ;;  %v430_v4 = vand.u32 2147483647, %v1927_v27  ;;  %vm426_vm6 = vweird.f32 %v1927_v27 }
 0x1aa   :  { %1511 = vpow2.f32 %v1400_v44  ;;  %v323_v38 = vpop.f32.mrf.mxu2  ;;  %v369_v39 = vsel %vm368_vm14, %v1500_v17, %v365_v33  ;;  %v377_v40 = vmul.f32 %v1506_v15, %v354_v18  ;;  %vm382_vm1 = vweird.f32 %v1506_v15 }
 0x1ab   :  { %1513 = vrcp.f32 %v1932_v35  ;;  %v324_v41 = vadd.f32 %v1915_v58, %v323_v38  ;;  %v374_v28 = vsel %vm371_vm15, %v373_v37, %v369_v39  ;;  %vm383_vm3 = vmor %vm381_vm2, %vm382_vm1  ;;  %v433_v12 = vor.u32 1.1754944e-38, %v432_v0 }
 0x1ac   :  { %v481_v36 = vmul.f32 0.99, %v374_v28  ;;  %v378_v46 = vsub.f32 1.0, %v377_v40  ;;  %v400_v19 = vand.u32 2147483647, %v1932_v35  ;;  %v402_v16 = vand.u32 2147483648, %v1932_v35 }
 0x1ad   :  { %v1508_v47 = vpop.eup %1507  ;;  %v1403_v48 = vmul.f32 -1.442695, %v324_v41  ;;  %580 = vst.msk [vmem:[#allocation4 + $0x30] sm:$0xff] %vm565_vm11, %v324_v41  ;;  %vm431_vm9 = vcmp.eq.f32.partialorder %v430_v4, 8.507059e+37  ;;  %vm396_vm10 = vweird.f32 %v1932_v35 }
 0x1ae   :  { %v1510_v53 = vpop.eup %1509  ;;  %v1937_v54 = vadd.f32 1.0, %v1508_v47  ;;  %v489_v55 = vadd.f32 0.01, %v481_v36  ;;  %v379_v57 = vmul.f32 %v1506_v15, %v378_v46  ;;  %v403_v42 = vor.u32 1.1754944e-38, %v402_v16 }
 0x1af   :  { %1515 = vpow2.f32 %v1403_v48  ;;  %v422_v59 = vmul.f32 %v1510_v53, %v1927_v27  ;;  %vm427_vm5 = vweird.f32 %v1510_v53  ;;  %vm401_vm13 = vcmp.eq.f32.partialorder %v400_v19, 8.507059e+37 }
 0x1b0   :  { %v1512_v61 = vpop.eup %1511  ;;  %1517 = vrcp.f32 %v1937_v54  ;;  %503 = vperm.xlu1 %1462, %v489_v55   ;;  %v380_v62 = vadd.f32 %v1506_v15, %v379_v57  ;;  %vm428_vm7 = vmor %vm426_vm6, %vm427_vm5  ;;  %v445_v0 = vand.u32 2147483647, %v1937_v54 }
 0x1b1   :  { %v1514_v1 = vpop.eup %1513  ;;  %v1942_v29 = vadd.f32 1.0, %v1512_v61  ;;  %v423_v51 = vsub.f32 1.0, %v422_v59  ;;  %v447_v59 = vand.u32 2147483648, %v1937_v54 }
 0x1b2   :  { %v326_v60 = vpop.f32.mrf.mxu2  ;;  %v384_v3 = vsel %vm383_vm3, %v1506_v15, %v380_v62  ;;  %v392_v5 = vmul.f32 %v1514_v1, %v1932_v35  ;;  %vm397_vm8 = vweird.f32 %v1514_v1  ;;  %vm441_vm3 = vweird.f32 %v1937_v54 }
 0x1b3   :  { %1519 = vrcp.f32 %v1942_v29  ;;  %v327_v6 = vadd.f32 %v1915_v58, %v326_v60  ;;  %v389_v8 = vsel %vm386_vm4, %v388_v2, %v384_v3  ;;  %v424_v10 = vmul.f32 %v1510_v53, %v423_v51  ;;  %vm398_vm12 = vmor %vm396_vm10, %vm397_vm8 }
 0x1b4   :  { %v482_v11 = vmul.f32 0.99, %v389_v8  ;;  %v393_v13 = vsub.f32 1.0, %v392_v5  ;;  %v415_v28 = vand.u32 2147483647, %v1942_v29  ;;  %v417_v35 = vand.u32 2147483648, %v1942_v29 }
 0x1b5   :  { %v1516_v14 = vpop.eup %1515  ;;  %v1404_v17 = vmul.f32 -1.442695, %v327_v6  ;;  %581 = vst.msk [vmem:[#allocation4 + $0x38] sm:$0xff] %vm565_vm11, %v327_v6  ;;  %v425_v18 = vadd.f32 %v1510_v53, %v424_v10  ;;  %vm411_vm15 = vweird.f32 %v1942_v29  ;;  %v448_v4 = vor.u32 1.1754944e-38, %v447_v59 }
 0x1b6   :  { %v1952_v20 = vpop.eup %1517  ;;  %v1954_v21 = vadd.f32 1.0, %v1516_v14  ;;  %v490_v58 = vadd.f32 0.01, %v482_v11  ;;  %v394_v7 = vmul.f32 %v1514_v1, %v393_v13  ;;  %v418_v55 = vor.u32 1.1754944e-38, %v417_v35  ;;  %v651_v35 = vld [vmem:[%s2372_s5] sm:$0xff] }
 0x1b7   :  { %1521 = vpow2.f32 %v1404_v17  ;;  %v429_v23 = vsel %vm428_vm7, %v1510_v53, %v425_v18  ;;  %v437_v24 = vmul.f32 %v1952_v20, %v1937_v54  ;;  %vm442_vm1 = vweird.f32 %v1952_v20 }
 0x1b8   :  { %1523 = vrcp.f32 %v1954_v21  ;;  %508 = vperm.xlu2 %1463, %v490_v58   ;;  %v434_v25 = vsel %vm431_vm9, %v433_v12, %v429_v23  ;;  %v395_v26 = vadd.f32 %v1514_v1, %v394_v7  ;;  %vm416_vm4 = vcmp.eq.f32.partialorder %v415_v28, 8.507059e+37  ;;  %vm443_vm6 = vmor %vm441_vm3, %vm442_vm1  ;;  %v652_v28 = vld [vmem:[%s2372_s5 + $0x8] sm:$0xff] }
 0x1b9   :  { %v1520_v27 = vpop.eup %1519  ;;  %v485_v30 = vmul.f32 0.99, %v434_v25  ;;  %v438_v31 = vsub.f32 1.0, %v437_v24  ;;  %v462_v62 = vand.u32 2147483648, %v1954_v21  ;;  %v460_v2 = vand.u32 2147483647, %v1954_v21  ;;  %692 = vmatpush.msra.mxu1 %v652_v28  ;;  %1457 = vmatpush.msra.mxu3 %v652_v28 }
 0x1ba   :  { %v399_v44 = vsel %vm398_vm12, %v1514_v1, %v395_v26  ;;  %v407_v33 = vmul.f32 %v1520_v27, %v1942_v29  ;;  %vm412_vm14 = vweird.f32 %v1520_v27  ;;  %vm456_vm7 = vweird.f32 %v1954_v21 }
 0x1bb   :  { %v493_v15 = vadd.f32 0.01, %v485_v30  ;;  %v404_v37 = vsel %vm401_vm13, %v403_v42, %v399_v44  ;;  %v439_v40 = vmul.f32 %v1952_v20, %v438_v31  ;;  %vm413_vm2 = vmor %vm411_vm15, %vm412_vm14  ;;  %v463_v8 = vor.u32 1.1754944e-38, %v462_v62  ;;  %v1468_v30 = vld [vmem:[%s2371_s2] ss:$0 sm:$0xff]  ;;  %693 = vmatpush.msra.mxu1 %v651_v35  ;;  %1458 = vmatpush.msra.mxu3 %v651_v35 }
 0x1bc   :  { %v483_v38 = vmul.f32 0.99, %v404_v37  ;;  %v408_v39 = vsub.f32 1.0, %v407_v33  ;;  %vm446_vm9 = vcmp.eq.f32.partialorder %v445_v0, 8.507059e+37  ;;  %vm461_vm10 = vcmp.eq.f32.partialorder %v460_v2, 8.507059e+37 }
 0x1bd   :  { %v1522_v41 = vpop.eup %1521  ;;  %523 = vperm.xlu1 %1462, %v493_v15   ;;  %v440_v53 = vadd.f32 %v1952_v20, %v439_v40 }
 0x1be   :  { %v1524_v36 = vpop.eup %1523  ;;  %v360_v46 = vadd.f32 1.0, %v1522_v41  ;;  %v491_v47 = vadd.f32 0.01, %v483_v38  ;;  %v409_v48 = vmul.f32 %v1520_v27, %v408_v39 }
 0x1bf   :  { %v452_v49 = vmul.f32 %v1524_v36, %v1954_v21  ;;  %vm457_vm5 = vweird.f32 %v1524_v36  ;;  %v444_v60 = vsel %vm443_vm6, %v1952_v20, %v440_v53 }
 0x1c0   :  { %1525 = vrcp.f32 %v360_v46  ;;  %513 = vperm.xlu0 %1464, %v491_v47   ;;  %v410_v45 = vadd.f32 %v1520_v27, %v409_v48  ;;  %vm458_vm8 = vmor %vm456_vm7, %vm457_vm5  ;;  %v449_v54 = vsel %vm446_vm9, %v448_v4, %v444_v60  ;;  %v477_v18 = vand.u32 2147483648, %v360_v46 }
 0x1c1   :  { %v453_v57 = vsub.f32 1.0, %v452_v49  ;;  %v486_v17 = vmul.f32 0.99, %v449_v54  ;;  %v475_v20 = vand.u32 2147483647, %v360_v46  ;;  %vm471_vm13 = vweird.f32 %v360_v46 }
 0x1c2   :  { %v414_v61 = vsel %vm413_vm2, %v1520_v27, %v410_v45  ;;  %v478_v7 = vor.u32 1.1754944e-38, %v477_v18  ;;  %v1601_v27 = vmov 0.0  }
 0x1c3   :  { %v419_v1 = vsel %vm416_vm4, %v418_v55, %v414_v61  ;;  %v454_v29 = vmul.f32 %v1524_v36, %v453_v57  ;;  %v494_v58 = vadd.f32 0.01, %v486_v17  ;;  %vm476_vm15 = vcmp.eq.f32.partialorder %v475_v20, 8.507059e+37  ;;  %586 = vst.msk [vmem:[#allocation2] sm:$0xff] %vm565_vm11, %v1601_v27  ;;  %v604_v20 = vld [vmem:[#allocation4 + $0x10] sm:$0xff] }
 0x1c4   :  { %v484_v51 = vmul.f32 0.99, %v419_v1 }
 0x1c5   :  { %v455_v3 = vadd.f32 %v1524_v36, %v454_v29 }
 0x1c6   :  { %v1526_v5 = vpop.eup %1525  ;;  %v492_v6 = vadd.f32 0.01, %v484_v51 }
 0x1c7   :  { %v459_v10 = vsel %vm458_vm8, %v1524_v36, %v455_v3  ;;  %v467_v11 = vmul.f32 %v1526_v5, %v360_v46  ;;  %vm472_vm12 = vweird.f32 %v1526_v5  ;;  %v590_v3 = vld [vmem:[#allocation4] sm:$0xff] }
 0x1c8   :  { %518 = vperm.xlu2 %1463, %v492_v6   ;;  %v464_v12 = vsel %vm461_vm10, %v463_v8, %v459_v10  ;;  %vm473_vm14 = vmor %vm471_vm13, %vm472_vm12  ;;  %v597_v10 = vld [vmem:[#allocation4 + $0x8] sm:$0xff] }
 0x1c9   :  { %v487_v13 = vmul.f32 0.99, %v464_v12  ;;  %v468_v14 = vsub.f32 1.0, %v467_v11 }
 0x1ca   :  { %v587_v61 = vld [vmem:[#allocation2] sm:$0xff] }
 0x1cb   :  { %v495_v19 = vadd.f32 0.01, %v487_v13  ;;  %v469_v16 = vmul.f32 %v1526_v5, %v468_v14 }
 0x1cd   :  { %533 = vperm.xlu1 %1462, %v495_v19   ;;  %v470_v21 = vadd.f32 %v1526_v5, %v469_v16 }
 0x1cf   :  { %v474_v23 = vsel %vm473_vm14, %v1526_v5, %v470_v21 }
 0x1d0   :  { %528 = vperm.xlu2 %1463, %v494_v58   ;;  %v479_v24 = vsel %vm476_vm15, %v478_v7, %v474_v23 }
 0x1d1   :  { %v488_v25 = vmul.f32 0.99, %v479_v24 }
 0x1d3   :  { %v496_v26 = vadd.f32 0.01, %v488_v25  ;;  %v611_v25 = vld [vmem:[#allocation4 + $0x18] sm:$0xff] }
 0x1d8   :  { %538 = vperm.xlu2 %1463, %v496_v26  }
 0x212   :  { %v509_v42 = vpop.permute.xlu2 %508 }
 0x213   :  { %v542_v31 = vmul.f32 %v1468_v30, %v509_v42  ;;  %v739_v42 = vld [vmem:[%s2373_s6 + $0x18] sm:$0xff] }
 0x214   :  { %777 = vmatpush.msrb.mxu2 %v739_v42 }
 0x215   :  { %v551_v44 = vmul.f32 1.442695, %v542_v31  ;;  %v738_v31 = vld [vmem:[%s2373_s6 + $0x10] sm:$0xff] }
 0x216   :  { %778 = vmatpush.msrb.mxu2 %v738_v31 }
 0x217   :  { %1527 = vpow2.f32 %v551_v44  ;;  %v618_v44 = vld [vmem:[#allocation4 + $0x20] sm:$0xff] }
 0x21d   :  { %v1528_v33 = vpop.eup %1527 }
 0x21e   :  { %567 = vst.msk [vmem:[#allocation3 + $0x8] sm:$0xff] %vm565_vm11, %v1528_v33 }
 0x222   :  { %v504_v15 = vpop.permute.xlu1 %503  ;;  %v519_v37 = vpop.permute.xlu2 %518 }
 0x223   :  { %v541_v38 = vmul.f32 %v1468_v30, %v504_v15  ;;  %v544_v39 = vmul.f32 %v1468_v30, %v519_v37  ;;  %v737_v15 = vld [vmem:[%s2373_s6 + $0x8] sm:$0xff] }
 0x224   :  { %779 = vmatpush.msrb.mxu2 %v737_v15 }
 0x225   :  { %v549_v40 = vmul.f32 1.442695, %v541_v38  ;;  %v555_v41 = vmul.f32 1.442695, %v544_v39  ;;  %v594_v5 = vld [vmem:[#allocation3 + $0x8] sm:$0xff] }
 0x227   :  { %1529 = vpow2.f32 %v549_v40  ;;  %v736_v40 = vld [vmem:[%s2373_s6] sm:$0xff] }
 0x228   :  { %1531 = vpow2.f32 %v555_v41  ;;  %v625_v41 = vld [vmem:[#allocation4 + $0x28] sm:$0xff]  ;;  %780 = vmatpush.msrb.mxu2 %v736_v40 }
 0x229   :  { %v1593_v40 = vld [vmem:[%s2367_s0 + $0x10] sm:$0xff] }
 0x22a   :  { %v529_v36 = vpop.permute.xlu2 %528 }
 0x22b   :  { %v546_v46 = vmul.f32 %v1468_v30, %v529_v36 }
 0x22d   :  { %v1530_v47 = vpop.eup %1529  ;;  %v559_v48 = vmul.f32 1.442695, %v546_v46  ;;  %v632_v46 = vld [vmem:[#allocation4 + $0x30] sm:$0xff] }
 0x22e   :  { %v1532_v49 = vpop.eup %1531  ;;  %566 = vst.msk [vmem:[#allocation3] sm:$0xff] %vm565_vm11, %v1530_v47 }
 0x22f   :  { %569 = vst.msk [vmem:[#allocation3 + $0x18] sm:$0xff] %vm565_vm11, %v1532_v49  ;;  %1533 = vpow2.f32 %v559_v48  ;;  %v524_v45 = vpop.permute.xlu1 %523 }
 0x230   :  { %v545_v53 = vmul.f32 %v1468_v30, %v524_v45 }
 0x232   :  { %v557_v55 = vmul.f32 1.442695, %v545_v53  ;;  %v539_v57 = vpop.permute.xlu2 %538  ;;  %v514_v59 = vpop.permute.xlu0 %513  ;;  %v639_v53 = vld [vmem:[#allocation4 + $0x38] sm:$0xff] }
 0x233   :  { %v548_v62 = vmul.f32 %v1468_v30, %v539_v57  ;;  %v543_v0 = vmul.f32 %v1468_v30, %v514_v59 }
 0x234   :  { %1535 = vpow2.f32 %v557_v55 }
 0x235   :  { %v1534_v1 = vpop.eup %1533  ;;  %v588_v29 = vld [vmem:[#allocation3] sm:$0xff]  ;;  %v563_v2 = vmul.f32 1.442695, %v548_v62  ;;  %v553_v51 = vmul.f32 1.442695, %v543_v0 }
 0x236   :  { %v589_v60 = vmul.f32 %v588_v29, %v587_v61  ;;  %571 = vst.msk [vmem:[#allocation3 + $0x28] sm:$0xff] %vm565_vm11, %v1534_v1  ;;  %v608_v23 = vld [vmem:[#allocation3 + $0x18] sm:$0xff] }
 0x237   :  { %1537 = vpow2.f32 %v563_v2  ;;  %v1469_v0 = vld [vmem:[%s2368_s1 + $0x5] ss:$0 sm:$0xff]  ;;  %v1470_v1 = vld [vmem:[%s2368_s1 + $0x4] ss:$0 sm:$0xff] }
 0x238   :  { %v591_v4 = vadd.f32 %v590_v3, %v589_v60  ;;  %1539 = vpow2.f32 %v553_v51  ;;  %v720_v51 = vmul.f32 %v1470_v1, %v1820_v9  ;;  %v723_v9 = vmul.f32 %v1470_v1, %v1900_v43 }
 0x239   :  { %v726_v43 = vmul.f32 %v1470_v1, %v1896_v56  ;;  %v1591_v56 = vld [vmem:[%s2367_s0] sm:$0xff] }
 0x23a   :  { %v1536_v6 = vpop.eup %1535  ;;  %592 = vst.msk [vmem:[#allocation4] sm:$0xff] %vm565_vm11, %v591_v4  ;;  %v595_v8 = vmul.f32 %v594_v5, %v591_v4  ;;  %v721_v5 = vmul.f32 %v1470_v1, %v1862_v34  ;;  %v724_v34 = vmul.f32 %v1470_v1, %v1858_v32  ;;  %v727_v32 = vmul.f32 %v1470_v1, %v1908_v63 }
 0x23b   :  { %570 = vst.msk [vmem:[#allocation3 + $0x20] sm:$0xff] %vm565_vm11, %v1536_v6 }
 0x23c   :  { %v598_v54 = vadd.f32 %v597_v10, %v595_v8 }
 0x23d   :  { %v1538_v11 = vpop.eup %1537  ;;  %v622_v37 = vld [vmem:[#allocation3 + $0x28] sm:$0xff] }
 0x23e   :  { %v1540_v12 = vpop.eup %1539  ;;  %573 = vst.msk [vmem:[#allocation3 + $0x38] sm:$0xff] %vm565_vm11, %v1538_v11 }
 0x23f   :  { %568 = vst.msk [vmem:[#allocation3 + $0x10] sm:$0xff] %vm565_vm11, %v1540_v12  ;;  %v534_v13 = vpop.permute.xlu1 %533 }
 0x240   :  { %599 = vst.msk [vmem:[#allocation4 + $0x8] sm:$0xff] %vm565_vm11, %v598_v54  ;;  %v547_v14 = vmul.f32 %v1468_v30, %v534_v13 }
 0x241   :  { %v643_v17 = vld [vmem:[#allocation4] sm:$0xff] }
 0x242   :  { %v561_v18 = vmul.f32 1.442695, %v547_v14  ;;  %1405 = vmatmul.msk.f32.vlgmr.msra.gmra.mxu1 %vm565_vm11, %v643_v17  ;;  %v615_v27 = vld [vmem:[#allocation3 + $0x20] sm:$0xff] }
 0x244   :  { %1541 = vpow2.f32 %v561_v18 }
 0x245   :  { %v636_v48 = vld [vmem:[#allocation3 + $0x38] sm:$0xff] }
 0x246   :  { %v601_v19 = vld [vmem:[#allocation3 + $0x10] sm:$0xff] }
 0x247   :  { %v602_v16 = vmul.f32 %v601_v19, %v598_v54  ;;  %v644_v58 = vld [vmem:[#allocation4 + $0x8] sm:$0xff]  ;;  %v722_v54 = vmul.f32 %v1470_v1, %v1886_v52  ;;  %v725_v52 = vmul.f32 %v1470_v1, %v1882_v50  ;;  %v1471_v50 = vld [vmem:[%s2368_s1 + $0x6] ss:$0 sm:$0xff] }
 0x249   :  { %v605_v21 = vadd.f32 %v604_v20, %v602_v16 }
 0x24a   :  { %v1542_v7 = vpop.eup %1541  ;;  %1406 = vmatmul.msk.f32.gmra.mxu1 %vm565_vm11, %v644_v58 }
 0x24b   :  { %v609_v24 = vmul.f32 %v608_v23, %v605_v21  ;;  %606 = vst.msk [vmem:[#allocation4 + $0x10] sm:$0xff] %vm565_vm11, %v605_v21 }
 0x24c   :  { %572 = vst.msk [vmem:[#allocation3 + $0x30] sm:$0xff] %vm565_vm11, %v1542_v7 }
 0x24d   :  { %v612_v26 = vadd.f32 %v611_v25, %v609_v24 }
 0x24f   :  { %613 = vst.msk [vmem:[#allocation4 + $0x18] sm:$0xff] %vm565_vm11, %v612_v26  ;;  %v616_v30 = vmul.f32 %v615_v27, %v612_v26 }
 0x251   :  { %v619_v33 = vadd.f32 %v618_v44, %v616_v30 }
 0x252   :  { %v645_v38 = vld [vmem:[#allocation4 + $0x10] sm:$0xff] }
 0x253   :  { %v623_v39 = vmul.f32 %v622_v37, %v619_v33  ;;  %620 = vst.msk [vmem:[#allocation4 + $0x20] sm:$0xff] %vm565_vm11, %v619_v33  ;;  %1407 = vmatmul.msk.f32.gmra.mxu1 %vm565_vm11, %v645_v38  ;;  %v629_v35 = vld [vmem:[#allocation3 + $0x30] sm:$0xff]  ;;  %v1592_v33 = vld [vmem:[%s2367_s0 + $0x8] sm:$0xff] }
 0x255   :  { %v626_v28 = vadd.f32 %v625_v41, %v623_v39 }
 0x256   :  { %v646_v49 = vld [vmem:[#allocation4 + $0x18] sm:$0xff] }
 0x257   :  { %v630_v36 = vmul.f32 %v629_v35, %v626_v28  ;;  %627 = vst.msk [vmem:[#allocation4 + $0x28] sm:$0xff] %vm565_vm11, %v626_v28 }
 0x259   :  { %v633_v47 = vadd.f32 %v632_v46, %v630_v36  ;;  %v1594_v46 = vld [vmem:[%s2367_s0 + $0x18] sm:$0xff] }
 0x25a   :  { %v647_v59 = vld [vmem:[#allocation4 + $0x20] sm:$0xff] }
 0x25b   :  { %1408 = vmatmul.msk.f32.gmra.mxu1 %vm565_vm11, %v646_v49  ;;  %634 = vst.msk [vmem:[#allocation4 + $0x30] sm:$0xff] %vm565_vm11, %v633_v47  ;;  %v637_v45 = vmul.f32 %v636_v48, %v633_v47 }
 0x25d   :  { %v640_v55 = vadd.f32 %v639_v53, %v637_v45  ;;  %v1595_v53 = vld [vmem:[%s2367_s0 + $0x20] sm:$0xff] }
 0x25e   :  { %v648_v57 = vld [vmem:[#allocation4 + $0x28] sm:$0xff] }
 0x25f   :  { %1410 = vmatmul.msk.f32.vlgmr.msra.gmra.mxu3 %vm565_vm11, %v648_v57  ;;  %641 = vst.msk [vmem:[#allocation4 + $0x38] sm:$0xff] %vm565_vm11, %v640_v55 }
 0x260   :  { %642 = vst.msk [vmem:[#allocation2] sm:$0xff] %vm565_vm11, %v640_v55 }
 0x262   :  { %v649_v61 = vld [vmem:[#allocation4 + $0x30] sm:$0xff] }
 0x263   :  { %1409 = vmatmul.msk.f32.gmra.mxu1 %vm565_vm11, %v647_v59 }
 0x266   :  { %v650_v62 = vld [vmem:[#allocation4 + $0x38] sm:$0xff] }
 0x267   :  { %1411 = vmatmul.msk.f32.gmra.mxu3 %vm565_vm11, %v649_v61 }
 0x26f   :  { %1412 = vmatmul.msk.f32.gmra.mxu3 %vm565_vm11, %v650_v62  ;;  %v1596_v62 = vld [vmem:[%s2367_s0 + $0x28] sm:$0xff] }
 0x2bf   :  { %v695_v29 = vpop.f32.mrf.mxu1 }
 0x2c0   :  { %v696_v2 = vadd.f32 %v1469_v0, %v695_v29 }
 0x2c2   :  { %v728_v60 = vadd.f32 %v720_v51, %v696_v2  ;;  %v1597_v51 = vld [vmem:[%s2367_s0 + $0x30] sm:$0xff] }
 0x2c4   :  { %1413 = vmatmul.msk.f32.vlgmr.msrb.gmra.mxu2 %vm54_vm0, %v728_v60 }
 0x2c7   :  { %v698_v3 = vpop.f32.mrf.mxu1 }
 0x2c8   :  { %v699_v4 = vadd.f32 %v1469_v0, %v698_v3 }
 0x2ca   :  { %v729_v6 = vadd.f32 %v721_v5, %v699_v4 }
 0x2cc   :  { %1414 = vmatmul.msk.f32.gmra.mxu2 %vm54_vm0, %v729_v6 }
 0x2d0   :  { %v701_v8 = vpop.f32.mrf.mxu1 }
 0x2d1   :  { %v702_v10 = vadd.f32 %v1469_v0, %v701_v8 }
 0x2d3   :  { %v730_v11 = vadd.f32 %v722_v54, %v702_v10 }
 0x2d5   :  { %1415 = vmatmul.msk.f32.gmra.mxu2 %vm54_vm0, %v730_v11 }
 0x2d8   :  { %v704_v12 = vpop.f32.mrf.mxu1 }
 0x2d9   :  { %v705_v13 = vadd.f32 %v1469_v0, %v704_v12 }
 0x2db   :  { %v731_v14 = vadd.f32 %v723_v9, %v705_v13  ;;  %v1598_v9 = vld [vmem:[%s2367_s0 + $0x38] sm:$0xff] }
 0x2dd   :  { %1416 = vmatmul.msk.f32.gmra.mxu2 %vm54_vm0, %v731_v14 }
 0x2e0   :  { %v707_v17 = vpop.f32.mrf.mxu1 }
 0x2e1   :  { %v708_v18 = vadd.f32 %v1469_v0, %v707_v17 }
 0x2e2   :  { %v710_v19 = vpop.f32.mrf.mxu3 }
 0x2e3   :  { %v732_v16 = vadd.f32 %v724_v34, %v708_v18  ;;  %v711_v20 = vadd.f32 %v1469_v0, %v710_v19 }
 0x2e5   :  { %1417 = vmatmul.msk.f32.gmra.mxu2 %vm54_vm0, %v732_v16  ;;  %v733_v58 = vadd.f32 %v725_v52, %v711_v20 }
 0x2ea   :  { %v713_v21 = vpop.f32.mrf.mxu3 }
 0x2eb   :  { %v714_v7 = vadd.f32 %v1469_v0, %v713_v21 }
 0x2ed   :  { %1418 = vmatmul.msk.f32.gmra.mxu2 %vm54_vm0, %v733_v58  ;;  %v734_v23 = vadd.f32 %v726_v43, %v714_v7 }
 0x2f2   :  { %v716_v24 = vpop.f32.mrf.mxu3 }
 0x2f3   :  { %v717_v25 = vadd.f32 %v1469_v0, %v716_v24 }
 0x2f5   :  { %1419 = vmatmul.msk.f32.gmra.mxu2 %vm54_vm0, %v734_v23  ;;  %v735_v26 = vadd.f32 %v727_v32, %v717_v25 }
 0x2fd   :  { %1420 = vmatmul.msk.f32.gmra.mxu2 %vm54_vm0, %v735_v26 }
 0x347   :  { %v782_v27 = vpop.f32.mrf.mxu2 }
 0x348   :  { %v783_v30 = vadd.f32 %v1471_v50, %v782_v27 }
 0x34a   :  { %v2051_v42 = vadd.f32 %v1591_v56, %v783_v30 }
 0x34c   :  { %v814_v31 = vsel %vm54_vm0, %v2051_v42, 0.0 }
 0x34d   :  { %815 = vadd.xlane.f32.xlu1 %v814_v31 }
 0x34f   :  { %v785_v63 = vpop.f32.mrf.mxu2 }
 0x350   :  { %v786_v44 = vadd.f32 %v1471_v50, %v785_v63 }
 0x352   :  { %v2058_v15 = vadd.f32 %v1592_v33, %v786_v44 }
 0x354   :  { %v817_v37 = vsel %vm54_vm0, %v2058_v15, 0.0 }
 0x355   :  { %818 = vadd.xlane.f32.xlu0 %v817_v37 }
 0x358   :  { %v788_v38 = vpop.f32.mrf.mxu2 }
 0x359   :  { %v789_v39 = vadd.f32 %v1471_v50, %v788_v38 }
 0x35b   :  { %v2065_v41 = vadd.f32 %v1593_v40, %v789_v39 }
 0x35d   :  { %v820_v28 = vsel %vm54_vm0, %v2065_v41, 0.0 }
 0x35e   :  { %821 = vadd.xlane.f32.xlu2 %v820_v28 }
 0x360   :  { %v791_v35 = vpop.f32.mrf.mxu2 }
 0x361   :  { %v792_v36 = vadd.f32 %v1471_v50, %v791_v35  ;;  %v1011_v35 = vld [vmem:[%s2374_s7 + $0x18] sm:$0xff] }
 0x362   :  { %1050 = vmatpush.msrb.mxu3 %v1011_v35 }
 0x363   :  { %v2072_v47 = vadd.f32 %v1594_v46, %v792_v36  ;;  %v1082_v36 = vld [vmem:[%s2375_s8 + $0x18] sm:$0xff] }
 0x364   :  { %1097 = vmatpush.msrb.mxu1 %v1082_v36 }
 0x365   :  { %v823_v48 = vsel %vm54_vm0, %v2072_v47, 0.0 }
 0x366   :  { %824 = vadd.xlane.f32.xlu1 %v823_v48  ;;  %v1010_v48 = vld [vmem:[%s2374_s7 + $0x10] sm:$0xff] }
 0x367   :  { %1051 = vmatpush.msrb.mxu3 %v1010_v48 }
 0x368   :  { %v794_v49 = vpop.f32.mrf.mxu2 }
 0x369   :  { %v795_v45 = vadd.f32 %v1471_v50, %v794_v49  ;;  %v1081_v49 = vld [vmem:[%s2375_s8 + $0x10] sm:$0xff] }
 0x36a   :  { %1098 = vmatpush.msrb.mxu1 %v1081_v49 }
 0x36b   :  { %v2079_v55 = vadd.f32 %v1595_v53, %v795_v45  ;;  %v1009_v53 = vld [vmem:[%s2374_s7 + $0x8] sm:$0xff] }
 0x36c   :  { %1052 = vmatpush.msrb.mxu3 %v1009_v53 }
 0x36d   :  { %v826_v57 = vsel %vm54_vm0, %v2079_v55, 0.0 }
 0x36e   :  { %827 = vadd.xlane.f32.xlu2 %v826_v57  ;;  %v1080_v57 = vld [vmem:[%s2375_s8 + $0x8] sm:$0xff] }
 0x36f   :  { %1099 = vmatpush.msrb.mxu1 %v1080_v57 }
 0x370   :  { %v797_v59 = vpop.f32.mrf.mxu2 }
 0x371   :  { %v798_v61 = vadd.f32 %v1471_v50, %v797_v59 }
 0x373   :  { %v2086_v0 = vadd.f32 %v1596_v62, %v798_v61  ;;  %v1008_v61 = vld [vmem:[%s2374_s7] sm:$0xff] }
 0x374   :  { %v1079_v62 = vld [vmem:[%s2375_s8] sm:$0xff]  ;;  %1053 = vmatpush.msrb.mxu3 %v1008_v61 }
 0x375   :  { %v829_v1 = vsel %vm54_vm0, %v2086_v0, 0.0  ;;  %1100 = vmatpush.msrb.mxu1 %v1079_v62 }
 0x376   :  { %830 = vadd.xlane.f32.xlu0 %v829_v1 }
 0x378   :  { %v800_v29 = vpop.f32.mrf.mxu2 }
 0x379   :  { %v801_v2 = vadd.f32 %v1471_v50, %v800_v29 }
 0x37b   :  { %v2093_v60 = vadd.f32 %v1597_v51, %v801_v2 }
 0x37d   :  { %v832_v3 = vsel %vm54_vm0, %v2093_v60, 0.0 }
 0x37e   :  { %833 = vadd.xlane.f32.xlu2 %v832_v3 }
 0x380   :  { %v803_v8 = vpop.f32.mrf.mxu2 }
 0x381   :  { %v804_v54 = vadd.f32 %v1471_v50, %v803_v8 }
 0x383   :  { %v2108_v14 = vadd.f32 %v1598_v9, %v804_v54 }
 0x385   :  { %v835_v34 = vsel %vm54_vm0, %v2108_v14, 0.0 }
 0x3c0   :  { %v816_v4 = vpop.xlane.xlu1 %815 }
 0x3c1   :  { %v838_v5 = vmul.f32 %v816_v4, %v1694_v22 }
 0x3c3   :  { %v2099_v6 = vsub.f32 %v2051_v42, %v838_v5 }
 0x3c5   :  { %v854_v10 = vmul.f32 %v2099_v6, %v2099_v6 }
 0x3c7   :  { %v862_v11 = vsel %vm54_vm0, %v854_v10, 0.0 }
 0x3c8   :  { %863 = vadd.xlane.f32.xlu1 %v862_v11  ;;  %v819_v12 = vpop.xlane.xlu0 %818 }
 0x3c9   :  { %v839_v13 = vmul.f32 %v819_v12, %v1694_v22 }
 0x3cb   :  { %v2111_v17 = vsub.f32 %v2058_v15, %v839_v13 }
 0x3cd   :  { %v855_v18 = vmul.f32 %v2111_v17, %v2111_v17 }
 0x3cf   :  { %v865_v19 = vsel %vm54_vm0, %v855_v18, 0.0 }
 0x3d0   :  { %836 = vadd.xlane.f32.xlu1 %v835_v34  ;;  %866 = vadd.xlane.f32.xlu0 %v865_v19 }
 0x3d1   :  { %v822_v16 = vpop.xlane.xlu2 %821 }
 0x3d2   :  { %v840_v20 = vmul.f32 %v822_v16, %v1694_v22 }
 0x3d4   :  { %v2120_v52 = vsub.f32 %v2065_v41, %v840_v20 }
 0x3d6   :  { %v856_v21 = vmul.f32 %v2120_v52, %v2120_v52 }
 0x3d8   :  { %v868_v58 = vsel %vm54_vm0, %v856_v21, 0.0  ;;  %v2190_v21 = vld [vmem:[%s2368_s1 + $0x2] ss:$0 sm:$0xff] }
 0x3d9   :  { %v825_v7 = vpop.xlane.xlu1 %824  ;;  %869 = vadd.xlane.f32.xlu2 %v868_v58 }
 0x3da   :  { %v841_v43 = vmul.f32 %v825_v7, %v1694_v22 }
 0x3dc   :  { %v2127_v23 = vsub.f32 %v2072_v47, %v841_v43 }
 0x3de   :  { %v857_v24 = vmul.f32 %v2127_v23, %v2127_v23 }
 0x3e0   :  { %v871_v25 = vsel %vm54_vm0, %v857_v24, 0.0  ;;  %v2196_v24 = vld [vmem:[%s2368_s1 + $0x3] ss:$0 sm:$0xff] }
 0x3e1   :  { %v828_v32 = vpop.xlane.xlu2 %827  ;;  %872 = vadd.xlane.f32.xlu0 %v871_v25 }
 0x3e2   :  { %v842_v26 = vmul.f32 %v828_v32, %v1694_v22 }
 0x3e4   :  { %v2134_v50 = vsub.f32 %v2079_v55, %v842_v26 }
 0x3e6   :  { %v858_v27 = vmul.f32 %v2134_v50, %v2134_v50 }
 0x3e8   :  { %v874_v30 = vsel %vm54_vm0, %v858_v27, 0.0 }
 0x3e9   :  { %875 = vadd.xlane.f32.xlu1 %v874_v30  ;;  %v831_v56 = vpop.xlane.xlu0 %830 }
 0x3ea   :  { %v843_v31 = vmul.f32 %v831_v56, %v1694_v22 }
 0x3ec   :  { %v2141_v63 = vsub.f32 %v2086_v0, %v843_v31 }
 0x3ee   :  { %v859_v44 = vmul.f32 %v2141_v63, %v2141_v63 }
 0x3f0   :  { %v877_v33 = vsel %vm54_vm0, %v859_v44, 0.0 }
 0x3f1   :  { %v834_v37 = vpop.xlane.xlu2 %833  ;;  %878 = vadd.xlane.f32.xlu2 %v877_v33 }
 0x3f2   :  { %v844_v38 = vmul.f32 %v834_v37, %v1694_v22 }
 0x3f4   :  { %v2148_v39 = vsub.f32 %v2093_v60, %v844_v38 }
 0x3f6   :  { %v860_v40 = vmul.f32 %v2148_v39, %v2148_v39 }
 0x3f8   :  { %v880_v28 = vsel %vm54_vm0, %v860_v40, 0.0 }
 0x3f9   :  { %881 = vadd.xlane.f32.xlu0 %v880_v28 }
 0x43b   :  { %v864_v46 = vpop.xlane.xlu1 %863 }
 0x43c   :  { %v886_v45 = vmul.f32 %v864_v46, %v1694_v22 }
 0x43e   :  { %v894_v59 = vadd.f32 1e-05, %v886_v45 }
 0x440   :  { %1543 = vrsqrt.f32 %v894_v59  ;;  %vm908_vm1 = vweird.f32 %v894_v59 }
 0x443   :  { %v837_v1 = vpop.xlane.xlu1 %836  ;;  %v867_v29 = vpop.xlane.xlu0 %866 }
 0x444   :  { %v845_v2 = vmul.f32 %v837_v1, %v1694_v22  ;;  %v887_v51 = vmul.f32 %v867_v29, %v1694_v22 }
 0x446   :  { %v1544_v3 = vpop.eup %1543  ;;  %v2181_v4 = vsub.f32 %v2108_v14, %v845_v2  ;;  %v895_v5 = vadd.f32 1e-05, %v887_v51 }
 0x447   :  { %v903_v8 = vmul.f32 %v1544_v3, %v894_v59  ;;  %vm909_vm11 = vweird.f32 %v1544_v3 }
 0x448   :  { %1545 = vrsqrt.f32 %v895_v5  ;;  %v861_v10 = vmul.f32 %v2181_v4, %v2181_v4  ;;  %vm910_vm2 = vmor %vm908_vm1, %vm909_vm11  ;;  %vm918_vm4 = vweird.f32 %v895_v5 }
 0x449   :  { %v904_v54 = vmul.f32 %v1544_v3, %v903_v8 }
 0x44a   :  { %v883_v11 = vsel %vm54_vm0, %v861_v10, 0.0 }
 0x44b   :  { %v905_v12 = vmul.f32 0.5, %v904_v54  ;;  %884 = vadd.xlane.f32.xlu1 %v883_v11 }
 0x44c   :  { %v870_v13 = vpop.xlane.xlu2 %869 }
 0x44d   :  { %v906_v9 = vsub.f32 1.5, %v905_v12  ;;  %v888_v18 = vmul.f32 %v870_v13, %v1694_v22 }
 0x44e   :  { %v1546_v34 = vpop.eup %1545 }
 0x44f   :  { %v907_v19 = vmul.f32 %v1544_v3, %v906_v9  ;;  %v913_v16 = vmul.f32 %v1546_v34, %v895_v5  ;;  %v896_v20 = vadd.f32 1e-05, %v888_v18  ;;  %vm919_vm3 = vweird.f32 %v1546_v34 }
 0x450   :  { %vm920_vm5 = vmor %vm918_vm4, %vm919_vm3 }
 0x451   :  { %v911_v58 = vsel %vm910_vm2, %v1544_v3, %v907_v19  ;;  %v914_v7 = vmul.f32 %v1546_v34, %v913_v16  ;;  %1547 = vrsqrt.f32 %v896_v20  ;;  %vm928_vm7 = vweird.f32 %v896_v20 }
 0x452   :  { %v982_v43 = vmul.f32 %v911_v58, %v2099_v6 }
 0x453   :  { %v915_v25 = vmul.f32 0.5, %v914_v7 }
 0x454   :  { %v873_v32 = vpop.xlane.xlu0 %872  ;;  %v991_v26 = vmul.f32 %v2190_v21, %v982_v43 }
 0x455   :  { %v916_v27 = vsub.f32 1.5, %v915_v25  ;;  %v889_v30 = vmul.f32 %v873_v32, %v1694_v22 }
 0x456   :  { %v1000_v56 = vadd.f32 %v2196_v24, %v991_v26 }
 0x457   :  { %v1548_v31 = vpop.eup %1547  ;;  %v917_v44 = vmul.f32 %v1546_v34, %v916_v27  ;;  %v897_v33 = vadd.f32 1e-05, %v889_v30 }
 0x458   :  { %v923_v6 = vmul.f32 %v1548_v31, %v896_v20  ;;  %1421 = vmatmul.msk.f32.vlgmr.msrb.gmra.mxu3 %vm54_vm0, %v1000_v56  ;;  %1429 = vmatmul.msk.f32.vlgmr.msrb.gmra.mxu1 %vm54_vm0, %v1000_v56  ;;  %vm929_vm6 = vweird.f32 %v1548_v31 }
 0x459   :  { %v921_v37 = vsel %vm920_vm5, %v1546_v34, %v917_v44  ;;  %1549 = vrsqrt.f32 %v897_v33  ;;  %vm930_vm8 = vmor %vm928_vm7, %vm929_vm6  ;;  %vm938_vm10 = vweird.f32 %v897_v33 }
 0x45a   :  { %v924_v38 = vmul.f32 %v1548_v31, %v923_v6  ;;  %v983_v40 = vmul.f32 %v921_v37, %v2111_v17 }
 0x45c   :  { %v925_v28 = vmul.f32 0.5, %v924_v38  ;;  %v876_v35 = vpop.xlane.xlu1 %875  ;;  %v992_v36 = vmul.f32 %v2190_v21, %v983_v40 }
 0x45d   :  { %v890_v46 = vmul.f32 %v876_v35, %v1694_v22 }
 0x45e   :  { %v926_v48 = vsub.f32 1.5, %v925_v28  ;;  %v1001_v49 = vadd.f32 %v2196_v24, %v992_v36 }
 0x45f   :  { %v1550_v45 = vpop.eup %1549  ;;  %v898_v53 = vadd.f32 1e-05, %v890_v46 }
 0x460   :  { %v927_v57 = vmul.f32 %v1548_v31, %v926_v48  ;;  %v933_v59 = vmul.f32 %v1550_v45, %v897_v33  ;;  %1422 = vmatmul.msk.f32.gmra.mxu3 %vm54_vm0, %v1001_v49  ;;  %1430 = vmatmul.msk.f32.gmra.mxu1 %vm54_vm0, %v1001_v49  ;;  %vm939_vm9 = vweird.f32 %v1550_v45 }
 0x461   :  { %1551 = vrsqrt.f32 %v898_v53  ;;  %vm940_vm12 = vmor %vm938_vm10, %vm939_vm9  ;;  %vm948_vm14 = vweird.f32 %v898_v53 }
 0x462   :  { %v931_v17 = vsel %vm930_vm8, %v1548_v31, %v927_v57  ;;  %v934_v61 = vmul.f32 %v1550_v45, %v933_v59 }
 0x463   :  { %v984_v62 = vmul.f32 %v931_v17, %v2120_v52 }
 0x464   :  { %v935_v1 = vmul.f32 0.5, %v934_v61  ;;  %v879_v29 = vpop.xlane.xlu2 %878 }
 0x465   :  { %v891_v2 = vmul.f32 %v879_v29, %v1694_v22  ;;  %v993_v51 = vmul.f32 %v2190_v21, %v984_v62 }
 0x466   :  { %v936_v3 = vsub.f32 1.5, %v935_v1 }
 0x467   :  { %v1552_v5 = vpop.eup %1551  ;;  %v899_v8 = vadd.f32 1e-05, %v891_v2  ;;  %v1002_v10 = vadd.f32 %v2196_v24, %v993_v51  ;;  %v2243_v51 = vld [vmem:[%s2376_s9 + $0x1] ss:$0 sm:$0xff] }
 0x468   :  { %v937_v54 = vmul.f32 %v1550_v45, %v936_v3  ;;  %v943_v11 = vmul.f32 %v1552_v5, %v898_v53  ;;  %vm949_vm13 = vweird.f32 %v1552_v5 }
 0x469   :  { %1553 = vrsqrt.f32 %v899_v8  ;;  %1423 = vmatmul.msk.f32.gmra.mxu3 %vm54_vm0, %v1002_v10  ;;  %1431 = vmatmul.msk.f32.gmra.mxu1 %vm54_vm0, %v1002_v10  ;;  %vm950_vm15 = vmor %vm948_vm14, %vm949_vm13  ;;  %vm958_vm1 = vweird.f32 %v899_v8  ;;  %v1299_v10 = vld [vmem:[%s2377_s10 + $0x28] sm:$0xff]  ;;  %vm1303_vm14 = vcmask 523264  }
 0x46a   :  { %v941_v52 = vsel %vm940_vm12, %v1550_v45, %v937_v54  ;;  %v944_v12 = vmul.f32 %v1552_v5, %v943_v11 }
 0x46b   :  { %v985_v13 = vmul.f32 %v941_v52, %v2127_v23  ;;  %v1298_v52 = vld [vmem:[%s2377_s10 + $0x20] sm:$0xff] }
 0x46c   :  { %v945_v9 = vmul.f32 0.5, %v944_v12  ;;  %v882_v18 = vpop.xlane.xlu0 %881 }
 0x46d   :  { %v892_v34 = vmul.f32 %v882_v18, %v1694_v22  ;;  %v994_v19 = vmul.f32 %v2190_v21, %v985_v13 }
 0x46e   :  { %v946_v16 = vsub.f32 1.5, %v945_v9 }
 0x46f   :  { %v1554_v20 = vpop.eup %1553  ;;  %v900_v58 = vadd.f32 1e-05, %v892_v34  ;;  %v1003_v7 = vadd.f32 %v2196_v24, %v994_v19  ;;  %v1294_v34 = vld [vmem:[%s2377_s10] sm:$0xff] }
 0x470   :  { %v947_v43 = vmul.f32 %v1552_v5, %v946_v16  ;;  %v953_v25 = vmul.f32 %v1554_v20, %v899_v8  ;;  %vm959_vm11 = vweird.f32 %v1554_v20 }
 0x471   :  { %1555 = vrsqrt.f32 %v900_v58  ;;  %1424 = vmatmul.msk.f32.gmra.mxu3 %vm54_vm0, %v1003_v7  ;;  %1432 = vmatmul.msk.f32.gmra.mxu1 %vm54_vm0, %v1003_v7  ;;  %vm960_vm2 = vmor %vm958_vm1, %vm959_vm11  ;;  %vm968_vm4 = vweird.f32 %v900_v58 }
 0x472   :  { %v951_v23 = vsel %vm950_vm15, %v1552_v5, %v947_v43  ;;  %v954_v32 = vmul.f32 %v1554_v20, %v953_v25 }
 0x473   :  { %v986_v26 = vmul.f32 %v951_v23, %v2134_v50 }
 0x474   :  { %v955_v27 = vmul.f32 0.5, %v954_v32 }
 0x475   :  { %v995_v30 = vmul.f32 %v2190_v21, %v986_v26 }
 0x476   :  { %v956_v56 = vsub.f32 1.5, %v955_v27 }
 0x477   :  { %v1556_v31 = vpop.eup %1555  ;;  %v1004_v44 = vadd.f32 %v2196_v24, %v995_v30 }
 0x478   :  { %v957_v33 = vmul.f32 %v1554_v20, %v956_v56  ;;  %v963_v6 = vmul.f32 %v1556_v31, %v900_v58  ;;  %vm969_vm3 = vweird.f32 %v1556_v31 }
 0x479   :  { %1425 = vmatmul.msk.f32.gmra.mxu3 %vm54_vm0, %v1004_v44  ;;  %1433 = vmatmul.msk.f32.gmra.mxu1 %vm54_vm0, %v1004_v44  ;;  %vm970_vm5 = vmor %vm968_vm4, %vm969_vm3 }
 0x47a   :  { %v961_v37 = vsel %vm960_vm2, %v1554_v20, %v957_v33  ;;  %v964_v38 = vmul.f32 %v1556_v31, %v963_v6 }
 0x47b   :  { %v987_v50 = vmul.f32 %v961_v37, %v2141_v63 }
 0x47c   :  { %v965_v40 = vmul.f32 0.5, %v964_v38  ;;  %v2286_v38 = vld [vmem:[%s2376_s9] ss:$0 sm:$0xff] }
 0x47d   :  { %v996_v28 = vmul.f32 %v2190_v21, %v987_v50 }
 0x47e   :  { %v966_v35 = vsub.f32 1.5, %v965_v40 }
 0x47f   :  { %v1005_v36 = vadd.f32 %v2196_v24, %v996_v28 }
 0x480   :  { %v967_v46 = vmul.f32 %v1556_v31, %v966_v35 }
 0x481   :  { %1426 = vmatmul.msk.f32.gmra.mxu3 %vm54_vm0, %v1005_v36  ;;  %1434 = vmatmul.msk.f32.gmra.mxu1 %vm54_vm0, %v1005_v36 }
 0x482   :  { %v971_v48 = vsel %vm970_vm5, %v1556_v31, %v967_v46 }
 0x483   :  { %v988_v49 = vmul.f32 %v971_v48, %v2148_v39  ;;  %v1301_v39 = vld [vmem:[%s2377_s10 + $0x38] sm:$0xff] }
 0x484   :  { %1336 = vmatpush.msrb.mxu0 %v1301_v39 }
 0x485   :  { %v997_v45 = vmul.f32 %v2190_v21, %v988_v49 }
 0x487   :  { %v1006_v63 = vadd.f32 %v2196_v24, %v997_v45 }
 0x489   :  { %1427 = vmatmul.msk.f32.gmra.mxu3 %vm54_vm0, %v1006_v63  ;;  %1435 = vmatmul.msk.f32.gmra.mxu1 %vm54_vm0, %v1006_v63 }
 0x4be   :  { %v885_v53 = vpop.xlane.xlu1 %884 }
 0x4bf   :  { %v893_v57 = vmul.f32 %v885_v53, %v1694_v22  ;;  %v1300_v22 = vld [vmem:[%s2377_s10 + $0x30] sm:$0xff] }
 0x4c0   :  { %1337 = vmatpush.msrb.mxu0 %v1300_v22 }
 0x4c1   :  { %v901_v59 = vadd.f32 1e-05, %v893_v57 }
 0x4c2   :  { %1338 = vmatpush.msrb.mxu0 %v1299_v10 }
 0x4c3   :  { %1557 = vrsqrt.f32 %v901_v59  ;;  %vm978_vm7 = vweird.f32 %v901_v59 }
 0x4c4   :  { %1339 = vmatpush.msrb.mxu0 %v1298_v52 }
 0x4c9   :  { %v1558_v17 = vpop.eup %1557 }
 0x4ca   :  { %v973_v61 = vmul.f32 %v1558_v17, %v901_v59  ;;  %vm979_vm6 = vweird.f32 %v1558_v17 }
 0x4cb   :  { %vm980_vm8 = vmor %vm978_vm7, %vm979_vm6 }
 0x4cc   :  { %v974_v62 = vmul.f32 %v1558_v17, %v973_v61 }
 0x4ce   :  { %v975_v1 = vmul.f32 0.5, %v974_v62 }
 0x4d0   :  { %v976_v29 = vsub.f32 1.5, %v975_v1 }
 0x4d2   :  { %v977_v2 = vmul.f32 %v1558_v17, %v976_v29 }
 0x4d4   :  { %v981_v3 = vsel %vm980_vm8, %v1558_v17, %v977_v2 }
 0x4d5   :  { %v1102_v5 = vpop.f32.mrf.mxu1  ;;  %v989_v8 = vmul.f32 %v981_v3, %v2181_v4  ;;  %v1297_v4 = vld [vmem:[%s2377_s10 + $0x18] sm:$0xff] }
 0x4d6   :  { %v1103_v54 = vadd.f32 %v2243_v51, %v1102_v5  ;;  %1340 = vmatpush.msrb.mxu0 %v1297_v4 }
 0x4d7   :  { %v998_v11 = vmul.f32 %v2190_v21, %v989_v8  ;;  %v1296_v21 = vld [vmem:[%s2377_s10 + $0x10] sm:$0xff] }
 0x4d8   :  { %v1437_v12 = vmul.f32 -1.442695, %v1103_v54  ;;  %1341 = vmatpush.msrb.mxu0 %v1296_v21 }
 0x4d9   :  { %v1007_v13 = vadd.f32 %v2196_v24, %v998_v11  ;;  %v1295_v24 = vld [vmem:[%s2377_s10 + $0x8] sm:$0xff] }
 0x4da   :  { %1559 = vpow2.f32 %v1437_v12  ;;  %1342 = vmatpush.msrb.mxu0 %v1295_v24 }
 0x4db   :  { %1428 = vmatmul.msk.f32.gmra.mxu3 %vm54_vm0, %v1007_v13  ;;  %1436 = vmatmul.msk.f32.gmra.mxu1 %vm54_vm0, %v1007_v13  ;;  %v1055_v58 = vpop.f32.mrf.mxu3 }
 0x4dc   :  { %1343 = vmatpush.msrb.mxu0 %v1294_v34  ;;  %v1056_v53 = vadd.f32 %v2286_v38, %v1055_v58 }
 0x4dd   :  { %v1105_v9 = vpop.f32.mrf.mxu1 }
 0x4de   :  { %v2270_v18 = vadd.f32 %v2243_v51, %v1105_v9 }
 0x4e0   :  { %v1560_v19 = vpop.eup %1559  ;;  %v1438_v16 = vmul.f32 -1.442695, %v2270_v18 }
 0x4e1   :  { %v1150_v20 = vadd.f32 1.0, %v1560_v19 }
 0x4e2   :  { %1561 = vpow2.f32 %v1438_v16 }
 0x4e3   :  { %1563 = vrcp.f32 %v1150_v20  ;;  %v1169_v56 = vand.u32 2147483648, %v1150_v20  ;;  %v1167_v44 = vand.u32 2147483647, %v1150_v20  ;;  %vm1163_vm10 = vweird.f32 %v1150_v20  ;;  %v1058_v50 = vpop.f32.mrf.mxu3 }
 0x4e4   :  { %v1059_v12 = vadd.f32 %v2286_v38, %v1058_v50 }
 0x4e5   :  { %v1170_v28 = vor.u32 1.1754944e-38, %v1169_v56  ;;  %vm1168_vm13 = vcmp.eq.f32.partialorder %v1167_v44, 8.507059e+37 }
 0x4e6   :  { %v1108_v7 = vpop.f32.mrf.mxu1 }
 0x4e7   :  { %v2277_v43 = vadd.f32 %v2243_v51, %v1108_v7 }
 0x4e8   :  { %v1562_v25 = vpop.eup %1561 }
 0x4e9   :  { %v1564_v23 = vpop.eup %1563  ;;  %v1151_v32 = vadd.f32 1.0, %v1562_v25  ;;  %v1439_v26 = vmul.f32 -1.442695, %v2277_v43 }
 0x4ea   :  { %v1159_v27 = vmul.f32 %v1564_v23, %v1150_v20  ;;  %vm1164_vm9 = vweird.f32 %v1564_v23 }
 0x4eb   :  { %1565 = vrcp.f32 %v1151_v32  ;;  %vm1165_vm12 = vmor %vm1163_vm10, %vm1164_vm9  ;;  %v1184_v59 = vand.u32 2147483648, %v1151_v32  ;;  %v1182_v62 = vand.u32 2147483647, %v1151_v32  ;;  %vm1178_vm11 = vweird.f32 %v1151_v32 }
 0x4ec   :  { %v1160_v30 = vsub.f32 1.0, %v1159_v27  ;;  %1567 = vpow2.f32 %v1439_v26  ;;  %v1061_v8 = vpop.f32.mrf.mxu3 }
 0x4ed   :  { %v1185_v22 = vor.u32 1.1754944e-38, %v1184_v59  ;;  %vm1183_vm2 = vcmp.eq.f32.partialorder %v1182_v62, 8.507059e+37  ;;  %v1062_v44 = vadd.f32 %v2286_v38, %v1061_v8 }
 0x4ee   :  { %v1161_v31 = vmul.f32 %v1564_v23, %v1160_v30  ;;  %v1111_v33 = vpop.f32.mrf.mxu1 }
 0x4ef   :  { %v2281_v6 = vadd.f32 %v2243_v51, %v1111_v33 }
 0x4f0   :  { %v1162_v37 = vadd.f32 %v1564_v23, %v1161_v31 }
 0x4f1   :  { %v1566_v40 = vpop.eup %1565  ;;  %v1440_v35 = vmul.f32 -1.442695, %v2281_v6 }
 0x4f2   :  { %v1568_v36 = vpop.eup %1567  ;;  %v1166_v46 = vsel %vm1165_vm12, %v1564_v23, %v1162_v37  ;;  %v1174_v48 = vmul.f32 %v1566_v40, %v1151_v32  ;;  %vm1179_vm15 = vweird.f32 %v1566_v40 }
 0x4f3   :  { %v1171_v49 = vsel %vm1168_vm13, %v1170_v28, %v1166_v46  ;;  %v1152_v45 = vadd.f32 1.0, %v1568_v36  ;;  %1569 = vpow2.f32 %v1440_v35  ;;  %vm1180_vm1 = vmor %vm1178_vm11, %vm1179_vm15 }
 0x4f4   :  { %v1278_v63 = vmul.f32 %v1171_v49, %v1103_v54  ;;  %v1175_v57 = vsub.f32 1.0, %v1174_v48  ;;  %v1064_v27 = vpop.f32.mrf.mxu3 }
 0x4f5   :  { %1571 = vrcp.f32 %v1152_v45  ;;  %v1199_v24 = vand.u32 2147483648, %v1152_v45  ;;  %v1197_v16 = vand.u32 2147483647, %v1152_v45  ;;  %vm1193_vm4 = vweird.f32 %v1152_v45 }
 0x4f6   :  { %v1286_v17 = vmul.f32 %v1278_v63, %v1056_v53  ;;  %v1176_v61 = vmul.f32 %v1566_v40, %v1175_v57  ;;  %v1114_v1 = vpop.f32.mrf.mxu1 }
 0x4f7   :  { %v2291_v29 = vadd.f32 %v2243_v51, %v1114_v1  ;;  %v1200_v23 = vor.u32 1.1754944e-38, %v1199_v24  ;;  %vm1198_vm6 = vcmp.eq.f32.partialorder %v1197_v16, 8.507059e+37 }
 0x4f8   :  { %v1177_v39 = vadd.f32 %v1566_v40, %v1176_v61  ;;  %1445 = vmatmul.msk.f32.vlgmr.msrb.gmra.mxu0 %vm1303_vm14, %v1286_v17  ;;  %v1065_v17 = vadd.f32 %v2286_v38, %v1064_v27 }
 0x4f9   :  { %v1570_v2 = vpop.eup %1569  ;;  %v1441_v3 = vmul.f32 -1.442695, %v2291_v29 }
 0x4fa   :  { %v1181_v5 = vsel %vm1180_vm1, %v1566_v40, %v1177_v39  ;;  %v1153_v10 = vadd.f32 1.0, %v1570_v2 }
 0x4fb   :  { %v1572_v54 = vpop.eup %1571  ;;  %v1186_v11 = vsel %vm1183_vm2, %v1185_v22, %v1181_v5  ;;  %1573 = vpow2.f32 %v1441_v3 }
 0x4fc   :  { %v1279_v52 = vmul.f32 %v1186_v11, %v2270_v18  ;;  %v1189_v13 = vmul.f32 %v1572_v54, %v1152_v45  ;;  %1575 = vrcp.f32 %v1153_v10  ;;  %vm1194_vm3 = vweird.f32 %v1572_v54  ;;  %v1067_v1 = vpop.f32.mrf.mxu3 }
 0x4fd   :  { %vm1195_vm5 = vmor %vm1193_vm4, %vm1194_vm3  ;;  %v1214_v33 = vand.u32 2147483648, %v1153_v10  ;;  %v1212_v40 = vand.u32 2147483647, %v1153_v10  ;;  %vm1208_vm8 = vweird.f32 %v1153_v10 }
 0x4fe   :  { %v1287_v4 = vmul.f32 %v1279_v52, %v1059_v12  ;;  %v1190_v21 = vsub.f32 1.0, %v1189_v13  ;;  %v1117_v9 = vpop.f32.mrf.mxu1  ;;  %v1068_v13 = vadd.f32 %v2286_v38, %v1067_v1 }
 0x4ff   :  { %v2298_v34 = vadd.f32 %v2243_v51, %v1117_v9  ;;  %v1215_v45 = vor.u32 1.1754944e-38, %v1214_v33  ;;  %vm1213_vm10 = vcmp.eq.f32.partialorder %v1212_v40, 8.507059e+37 }
 0x500   :  { %v1191_v19 = vmul.f32 %v1572_v54, %v1190_v21  ;;  %1446 = vmatmul.msk.f32.gmra.mxu0 %vm1303_vm14, %v1287_v4 }
 0x501   :  { %v1574_v20 = vpop.eup %1573  ;;  %v1442_v58 = vmul.f32 -1.442695, %v2298_v34 }
 0x502   :  { %v1576_v18 = vpop.eup %1575  ;;  %v1192_v7 = vadd.f32 %v1572_v54, %v1191_v19  ;;  %v1154_v25 = vadd.f32 1.0, %v1574_v20 }
 0x503   :  { %v1204_v32 = vmul.f32 %v1576_v18, %v1153_v10  ;;  %1577 = vpow2.f32 %v1442_v58  ;;  %vm1209_vm7 = vweird.f32 %v1576_v18 }
 0x504   :  { %v1196_v26 = vsel %vm1195_vm5, %v1572_v54, %v1192_v7  ;;  %1579 = vrcp.f32 %v1154_v25  ;;  %vm1210_vm9 = vmor %vm1208_vm8, %vm1209_vm7  ;;  %v1229_v62 = vand.u32 2147483648, %v1154_v25  ;;  %v1227_v22 = vand.u32 2147483647, %v1154_v25  ;;  %v1070_v16 = vpop.f32.mrf.mxu3 }
 0x505   :  { %v1201_v30 = vsel %vm1198_vm6, %v1200_v23, %v1196_v26  ;;  %v1205_v56 = vsub.f32 1.0, %v1204_v32  ;;  %vm1223_vm13 = vweird.f32 %v1154_v25  ;;  %v1071_v32 = vadd.f32 %v2286_v38, %v1070_v16 }
 0x506   :  { %v1280_v31 = vmul.f32 %v1201_v30, %v2277_v43  ;;  %v1120_v37 = vpop.f32.mrf.mxu1  ;;  %v1230_v10 = vor.u32 1.1754944e-38, %v1229_v62  ;;  %vm1228_vm11 = vcmp.eq.f32.partialorder %v1227_v22, 8.507059e+37 }
 0x507   :  { %v1206_v50 = vmul.f32 %v1576_v18, %v1205_v56  ;;  %v2305_v28 = vadd.f32 %v2243_v51, %v1120_v37 }
 0x508   :  { %v1288_v35 = vmul.f32 %v1280_v31, %v1062_v44 }
 0x509   :  { %v1578_v36 = vpop.eup %1577  ;;  %v1207_v46 = vadd.f32 %v1576_v18, %v1206_v50  ;;  %v1443_v48 = vmul.f32 -1.442695, %v2305_v28 }
 0x50a   :  { %v1580_v49 = vpop.eup %1579  ;;  %v1155_v43 = vadd.f32 1.0, %v1578_v36  ;;  %1447 = vmatmul.msk.f32.gmra.mxu0 %vm1303_vm14, %v1288_v35 }
 0x50b   :  { %v1211_v63 = vsel %vm1210_vm9, %v1576_v18, %v1207_v46  ;;  %v1219_v53 = vmul.f32 %v1580_v49, %v1154_v25  ;;  %1581 = vpow2.f32 %v1443_v48  ;;  %vm1224_vm12 = vweird.f32 %v1580_v49 }
 0x50c   :  { %v1216_v57 = vsel %vm1213_vm10, %v1215_v45, %v1211_v63  ;;  %1583 = vrcp.f32 %v1155_v43  ;;  %vm1225_vm15 = vmor %vm1223_vm13, %vm1224_vm12  ;;  %v1244_v21 = vand.u32 2147483648, %v1155_v43  ;;  %v1242_v19 = vand.u32 2147483647, %v1155_v43  ;;  %v1073_v37 = vpop.f32.mrf.mxu3 }
 0x50d   :  { %v1281_v59 = vmul.f32 %v1216_v57, %v2281_v6  ;;  %v1220_v61 = vsub.f32 1.0, %v1219_v53  ;;  %vm1238_vm2 = vweird.f32 %v1155_v43  ;;  %v1074_v35 = vadd.f32 %v2286_v38, %v1073_v37 }
 0x50e   :  { %v1245_v18 = vor.u32 1.1754944e-38, %v1244_v21  ;;  %vm1243_vm4 = vcmp.eq.f32.partialorder %v1242_v19, 8.507059e+37 }
 0x50f   :  { %v1289_v39 = vmul.f32 %v1281_v59, %v1065_v17  ;;  %v1221_v2 = vmul.f32 %v1580_v49, %v1220_v61  ;;  %v1476_v61 = vld [vmem:[%s2368_s1 + $0x7] ss:$0 sm:$0xff] }
 0x511   :  { %v1582_v3 = vpop.eup %1581  ;;  %v1222_v5 = vadd.f32 %v1580_v49, %v1221_v2 }
 0x512   :  { %v1584_v8 = vpop.eup %1583  ;;  %v1156_v54 = vadd.f32 1.0, %v1582_v3  ;;  %1448 = vmatmul.msk.f32.gmra.mxu0 %vm1303_vm14, %v1289_v39 }
 0x513   :  { %v1226_v11 = vsel %vm1225_vm15, %v1580_v49, %v1222_v5  ;;  %v1234_v6 = vmul.f32 %v1584_v8, %v1155_v43  ;;  %vm1239_vm1 = vweird.f32 %v1584_v8 }
 0x514   :  { %v1231_v52 = vsel %vm1228_vm11, %v1230_v10, %v1226_v11  ;;  %1585 = vrcp.f32 %v1156_v54  ;;  %vm1240_vm3 = vmor %vm1238_vm2, %vm1239_vm1  ;;  %v1259_v27 = vand.u32 2147483648, %v1156_v54  ;;  %v1257_v31 = vand.u32 2147483647, %v1156_v54 }
 0x515   :  { %v1282_v12 = vmul.f32 %v1231_v52, %v2291_v29  ;;  %v1235_v4 = vsub.f32 1.0, %v1234_v6  ;;  %vm1253_vm6 = vweird.f32 %v1156_v54 }
 0x516   :  { %v1260_v33 = vor.u32 1.1754944e-38, %v1259_v27  ;;  %vm1258_vm8 = vcmp.eq.f32.partialorder %v1257_v31, 8.507059e+37 }
 0x517   :  { %v1290_v9 = vmul.f32 %v1282_v12, %v1068_v13  ;;  %v1236_v24 = vmul.f32 %v1584_v8, %v1235_v4 }
 0x519   :  { %v1237_v20 = vadd.f32 %v1584_v8, %v1236_v24 }
 0x51a   :  { %v1586_v58 = vpop.eup %1585  ;;  %1449 = vmatmul.msk.f32.gmra.mxu0 %vm1303_vm14, %v1290_v9 }
 0x51b   :  { %v1241_v7 = vsel %vm1240_vm3, %v1584_v8, %v1237_v20  ;;  %v1249_v25 = vmul.f32 %v1586_v58, %v1156_v54  ;;  %vm1254_vm5 = vweird.f32 %v1586_v58 }
 0x51c   :  { %v1246_v29 = vsel %vm1243_vm4, %v1245_v18, %v1241_v7  ;;  %vm1255_vm7 = vmor %vm1253_vm6, %vm1254_vm5 }
 0x51d   :  { %v1283_v23 = vmul.f32 %v1246_v29, %v2298_v34  ;;  %v1250_v26 = vsub.f32 1.0, %v1249_v25 }
 0x51f   :  { %v1291_v30 = vmul.f32 %v1283_v23, %v1071_v32  ;;  %v1251_v56 = vmul.f32 %v1586_v58, %v1250_v26 }
 0x521   :  { %v1252_v44 = vadd.f32 %v1586_v58, %v1251_v56 }
 0x522   :  { %1450 = vmatmul.msk.f32.gmra.mxu0 %vm1303_vm14, %v1291_v30 }
 0x523   :  { %v1256_v50 = vsel %vm1255_vm7, %v1586_v58, %v1252_v44 }
 0x524   :  { %v1261_v40 = vsel %vm1258_vm8, %v1260_v33, %v1256_v50 }
 0x525   :  { %v1284_v34 = vmul.f32 %v1261_v40, %v2305_v28 }
 0x527   :  { %v1292_v36 = vmul.f32 %v1284_v34, %v1074_v35 }
 0x52a   :  { %1451 = vmatmul.msk.f32.gmra.mxu0 %vm1303_vm14, %v1292_v36 }
 0x558   :  { %v1123_v46 = vpop.f32.mrf.mxu1 }
 0x559   :  { %v1124_v48 = vadd.f32 %v2243_v51, %v1123_v46 }
 0x55b   :  { %v1444_v49 = vmul.f32 -1.442695, %v1124_v48 }
 0x55d   :  { %1587 = vpow2.f32 %v1444_v49 }
 0x55e   :  { %v1076_v1 = vpop.f32.mrf.mxu3 }
 0x55f   :  { %v1077_v8 = vadd.f32 %v2286_v38, %v1076_v1 }
 0x563   :  { %v1588_v45 = vpop.eup %1587 }
 0x564   :  { %v1157_v43 = vadd.f32 1.0, %v1588_v45 }
 0x566   :  { %1589 = vrcp.f32 %v1157_v43  ;;  %v1274_v59 = vand.u32 2147483648, %v1157_v43  ;;  %v1272_v28 = vand.u32 2147483647, %v1157_v43  ;;  %vm1268_vm10 = vweird.f32 %v1157_v43 }
 0x568   :  { %v1275_v51 = vor.u32 1.1754944e-38, %v1274_v59  ;;  %vm1273_vm13 = vcmp.eq.f32.partialorder %v1272_v28, 8.507059e+37 }
 0x56c   :  { %v1590_v63 = vpop.eup %1589 }
 0x56d   :  { %v1264_v53 = vmul.f32 %v1590_v63, %v1157_v43  ;;  %vm1269_vm9 = vweird.f32 %v1590_v63 }
 0x56e   :  { %vm1270_vm12 = vmor %vm1268_vm10, %vm1269_vm9 }
 0x56f   :  { %v1265_v57 = vsub.f32 1.0, %v1264_v53 }
 0x571   :  { %v1266_v17 = vmul.f32 %v1590_v63, %v1265_v57 }
 0x573   :  { %v1267_v62 = vadd.f32 %v1590_v63, %v1266_v17 }
 0x575   :  { %v1271_v39 = vsel %vm1270_vm12, %v1590_v63, %v1267_v62  ;;  %v1345_v2 = vpop.f32.mrf.mxu0 }
 0x576   :  { %v1276_v22 = vsel %vm1273_vm13, %v1275_v51, %v1271_v39  ;;  %v1346_v3 = vadd.f32 %v1476_v61, %v1345_v2 }
 0x577   :  { %v1285_v5 = vmul.f32 %v1276_v22, %v1124_v48 }
 0x578   :  { %v1369_v10 = vadd.f32 %v1346_v3, %v2051_v42 }
 0x579   :  { %v1293_v54 = vmul.f32 %v1285_v5, %v1077_v8 }
 0x57a   :  { %1377 = vst.msk [vmem:[%s2378_s11] sm:$0xff] %vm54_vm0, %v1369_v10 }
 0x57b   :  { %1452 = vmatmul.msk.f32.gmra.mxu0 %vm1303_vm14, %v1293_v54 }
 0x57d   :  { %v1348_v11 = vpop.f32.mrf.mxu0 }
 0x57e   :  { %v1349_v6 = vadd.f32 %v1476_v61, %v1348_v11 }
 0x580   :  { %v1370_v52 = vadd.f32 %v1349_v6, %v2058_v15 }
 0x582   :  { %1378 = vst.msk [vmem:[%s2378_s11 + $0x8] sm:$0xff] %vm54_vm0, %v1370_v52 }
 0x587   :  { %v1351_v38 = vpop.f32.mrf.mxu0 }
 0x588   :  { %v1352_v12 = vadd.f32 %v1476_v61, %v1351_v38 }
 0x58a   :  { %v1371_v42 = vadd.f32 %v1352_v12, %v2065_v41 }
 0x58c   :  { %1379 = vst.msk [vmem:[%s2378_s11 + $0x10] sm:$0xff] %vm54_vm0, %v1371_v42 }
 0x58f   :  { %v1354_v13 = vpop.f32.mrf.mxu0 }
 0x590   :  { %v1355_v4 = vadd.f32 %v1476_v61, %v1354_v13 }
 0x592   :  { %v1372_v21 = vadd.f32 %v1355_v4, %v2072_v47 }
 0x594   :  { %1380 = vst.msk [vmem:[%s2378_s11 + $0x18] sm:$0xff] %vm54_vm0, %v1372_v21 }
 0x597   :  { %v1357_v15 = vpop.f32.mrf.mxu0 }
 0x598   :  { %v1358_v9 = vadd.f32 %v1476_v61, %v1357_v15 }
 0x59a   :  { %v1373_v24 = vadd.f32 %v1358_v9, %v2079_v55 }
 0x59c   :  { %1381 = vst.msk [vmem:[%s2378_s11 + $0x20] sm:$0xff] %vm54_vm0, %v1373_v24 }
 0x59f   :  { %v1360_v41 = vpop.f32.mrf.mxu0 }
 0x5a0   :  { %v1361_v19 = vadd.f32 %v1476_v61, %v1360_v41 }
 0x5a2   :  { %v1374_v16 = vadd.f32 %v1361_v19, %v2086_v0 }
 0x5a4   :  { %1382 = vst.msk [vmem:[%s2378_s11 + $0x28] sm:$0xff] %vm54_vm0, %v1374_v16 }
 0x5a7   :  { %v1363_v47 = vpop.f32.mrf.mxu0 }
 0x5a8   :  { %v1364_v20 = vadd.f32 %v1476_v61, %v1363_v47 }
 0x5aa   :  { %v1375_v58 = vadd.f32 %v1364_v20, %v2093_v60 }
 0x5ac   :  { %1383 = vst.msk [vmem:[%s2378_s11 + $0x30] sm:$0xff] %vm54_vm0, %v1375_v58 }
 0x5f8   :  { %v1366_v55 = vpop.f32.mrf.mxu0 }
 0x5f9   :  { %v1367_v18 = vadd.f32 %v1476_v61, %v1366_v55 }
 0x5fb   :  { %v1376_v7 = vadd.f32 %v1367_v18, %v2108_v14 }
 0x5fd   :  { %1384 = vst.msk [vmem:[%s2378_s11 + $0x38] sm:$0xff] %vm54_vm0, %v1376_v7 }

</bundles_post_ra>
